<compile_context>
chip_gen: v5e
topology: v5e:2x2
jax: 0.10.0
libtpu: 0.0.40
codegen_flags: <defaults>
</compile_context>

<pallas_src>
import functools
import numpy as np
import jax
import jax.numpy as jnp
from jax import lax
from jax.experimental import pallas as pl
from jax.experimental.pallas import tpu as pltpu

PAD = 6                      # max dilation; one zero-padded buffer serves all branches
BN_EPS = 1e-3
DILATIONS = (2, 4, 6)
# unique vertical tap offsets across the three dilated 3x3 convs: (-6,-4,-2,0,2,4,6)
V_OFFSETS = tuple(sorted({(i - 1) * d for d in DILATIONS for i in range(3)}))


def _padded_row_width(w, cin):
    """(W + 2*PAD) * Cin rounded up to a full 128-lane tile (lane-aligned blocks)."""
    return ((w + 2 * PAD) * cin + 127) // 128 * 128


# --------------------------------- kernel ------------------------------------

def dilate_even_down_kernel(cin, x_ref, wbig_ref, bbig_ref, w1big_ref, b1big_ref,
                            out_ref, xp_scr):
    # x_ref   : (1, H, W*Cin)        bf16  unpadded, (W,C)-packed input rows
    # wbig_ref: (7*CPAD, W*3*Hid)    bf16  structured dilated-conv weights (BN folded)
    # bbig_ref: (1, W*3*Hid)         f32   folded biases, tiled per W position
    # w1big   : (W*3*Hid, W*Hid)     bf16  block-diagonal 1x1 down-channel weights
    # b1big   : (1, W*Hid)           f32
    # out_ref : (1, H, W*Hid)        f32   lane-dense output rows
    # xp_scr  : (H+2*PAD, CPAD)      bf16  zero-padded, (W,C)-packed image buffer
    h = x_ref.shape[1]
    wc = x_ref.shape[2]                       # W * Cin
    c0 = PAD * cin

    # Zero-padded scratch; ReLU folded into the write (relu(0)==0, so padding is
    # still correct).  Scratch persists across grid steps -> re-zero every step.
    xp_scr[...] = jnp.zeros_like(xp_scr)
    xp_scr[PAD:PAD + h, c0:c0 + wc] = jnp.maximum(x_ref[0], 0.0)

    # "Row im2col": one lane-aligned 128-wide block per unique vertical offset.
    # All horizontal taps / dilations / channel concat live in the weight matrix.
    lhs = jnp.concatenate(
        [xp_scr[PAD + dv:PAD + dv + h, :] for dv in V_OFFSETS], axis=-1)   # (H, 7*CPAD)

    feat = jnp.dot(lhs, wbig_ref[...], preferred_element_type=jnp.float32)  # (H, W*3*Hid)
    feat = jnp.maximum(feat + bbig_ref[...], 0.0)                           # relu(BN(conv))

    out = jnp.dot(feat.astype(jnp.bfloat16), w1big_ref[...],
                  preferred_element_type=jnp.float32)                       # (H, W*Hid)
    out_ref[0] = jnp.maximum(out + b1big_ref[...], 0.0)


# --------------------------------- wrapper -----------------------------------

def dialate_even_down(x_nhwc, packed):
    """x_nhwc: (N, H, W, Cin) float32; packed: dict from pack_params()."""
    n, h, w, cin = x_nhwc.shape
    hid = packed["b1big"].shape[1] // w
    cpad = _padded_row_width(w, cin)
    hp = h + 2 * PAD

    # Lane-dense boundary layout: pack (W, C) into the last dim, cast to bf16.
    x_pk = x_nhwc.reshape(n, h, w * cin).astype(jnp.bfloat16)

    grid_spec = pltpu.PrefetchScalarGridSpec(
        num_scalar_prefetch=0,
        grid=(n,),
        in_specs=[
            pl.BlockSpec((1, h, w * cin), lambda i: (i, 0, 0)),
            pl.BlockSpec(packed["wbig"].shape, lambda i: (0, 0)),
            pl.BlockSpec(packed["bbig"].shape, lambda i: (0, 0)),
            pl.BlockSpec(packed["w1big"].shape, lambda i: (0, 0)),
            pl.BlockSpec(packed["b1big"].shape, lambda i: (0, 0)),
        ],
        out_specs=pl.BlockSpec((1, h, w * hid), lambda i: (i, 0, 0)),
        scratch_shapes=[pltpu.VMEM((hp, cpad), jnp.bfloat16)],
    )
    out = pl.pallas_call(
        functools.partial(dilate_even_down_kernel, cin),
        out_shape=jax.ShapeDtypeStruct((n, h, w * hid), jnp.float32),
        grid_spec=grid_spec,
        compiler_params=pltpu.CompilerParams(
            dimension_semantics=("parallel",)),
    )(x_pk, packed["wbig"], packed["bbig"], packed["w1big"], packed["b1big"])
    return out.reshape(n, h, w, hid)


# ------------------- parameter construction & packing ------------------------

def make_raw_params(key, cin, hid):
    ks = jax.random.split(key, 20)
    def bn(k):
        k1, k2, k3, k4 = jax.random.split(k, 4)
        return dict(gamma=1.0 + 0.1 * jax.random.normal(k1, (hid,), jnp.float32),
                    beta=0.1 * jax.random.normal(k2, (hid,), jnp.float32),
                    mean=0.1 * jax.random.normal(k3, (hid,), jnp.float32),
                    var=1.0 + 0.1 * jax.random.uniform(k4, (hid,), jnp.float32))
    raw = {}
    for idx, d in enumerate(DILATIONS):
        raw[f"conv{d}_w"] = 0.1 * jax.random.normal(ks[3 * idx], (3, 3, cin, hid), jnp.float32)
        raw[f"conv{d}_b"] = 0.1 * jax.random.normal(ks[3 * idx + 1], (hid,), jnp.float32)
        raw[f"bn{d}"] = bn(ks[3 * idx + 2])
    raw["conv1_w"] = 0.1 * jax.random.normal(ks[10], (1, 1, 3 * hid, hid), jnp.float32)
    raw["conv1_b"] = 0.1 * jax.random.normal(ks[11], (hid,), jnp.float32)
    raw["bn1"] = bn(ks[12])
    return raw


def _fold_bn(w_hwio, b, bnp):
    scale = np.asarray(bnp["gamma"]) / np.sqrt(np.asarray(bnp["var"]) + BN_EPS)
    w_eff = np.asarray(w_hwio) * scale                       # broadcast over out-channels
    b_eff = (np.asarray(b) - np.asarray(bnp["mean"])) * scale + np.asarray(bnp["beta"])
    return w_eff, b_eff


def pack_params(raw, w_img):
    """Fold BN and pack the conv weights into the two structured matmul operands."""
    cin, hid = raw["conv2_w"].shape[2], raw["conv2_w"].shape[3]
    nb = len(DILATIONS)
    cpad = _padded_row_width(w_img, cin)
    v_idx = {dv: i for i, dv in enumerate(V_OFFSETS)}

    k1, n1 = len(V_OFFSETS) * cpad, w_img * nb * hid
    wbig = np.zeros((k1, n1), np.float32)
    bbig = np.zeros((1, n1), np.float32)
    for bidx, d in enumerate(DILATIONS):
        w_eff, b_eff = _fold_bn(raw[f"conv{d}_w"], raw[f"conv{d}_b"], raw[f"bn{d}"])
        for i in range(3):
            v = v_idx[(i - 1) * d]
            for j in range(3):
                for w in range(w_img):
                    wp = w + PAD + (j - 1) * d            # padded column of this tap
                    r0 = v * cpad + wp * cin
                    c0 = w * nb * hid + bidx * hid
                    wbig[r0:r0 + cin, c0:c0 + hid] += w_eff[i, j]
        for w in range(w_img):
            c0 = w * nb * hid + bidx * hid
            bbig[0, c0:c0 + hid] = b_eff

    w1_eff, b1_eff = _fold_bn(raw["conv1_w"], raw["conv1_b"], raw["bn1"])
    w1_eff = w1_eff.reshape(nb * hid, hid)
    k2, n2 = w_img * nb * hid, w_img * hid
    w1big = np.zeros((k2, n2), np.float32)
    b1big = np.zeros((1, n2), np.float32)
    for w in range(w_img):
        w1big[w * nb * hid:(w + 1) * nb * hid, w * hid:(w + 1) * hid] = w1_eff
        b1big[0, w * hid:(w + 1) * hid] = b1_eff

    return dict(wbig=jnp.asarray(wbig, jnp.bfloat16),
                bbig=jnp.asarray(bbig, jnp.float32),
                w1big=jnp.asarray(w1big, jnp.bfloat16),
                b1big=jnp.asarray(b1big, jnp.float32))


# --------------------- plain-JAX reference (correctness) ---------------------

def reference(x, raw):
    xr = jnp.maximum(x, 0.0)
    def bn_apply(y, bnp):
        return bnp["gamma"] * (y - bnp["mean"]) / jnp.sqrt(bnp["var"] + BN_EPS) + bnp["beta"]
    feats = []
    for d in DILATIONS:
        y = lax.conv_general_dilated(
            xr, raw[f"conv{d}_w"], window_strides=(1, 1),
            padding=[(d, d), (d, d)], rhs_dilation=(d, d),
            dimension_numbers=("NHWC", "HWIO", "NHWC")) + raw[f"conv{d}_b"]
        feats.append(jnp.maximum(bn_apply(y, raw[f"bn{d}"]), 0.0))
    cat = jnp.concatenate(feats, axis=-1)
    y = lax.conv_general_dilated(
        cat, raw["conv1_w"], window_strides=(1, 1), padding="VALID",
        dimension_numbers=("NHWC", "HWIO", "NHWC")) + raw["conv1_b"]
    return jnp.maximum(bn_apply(y, raw["bn1"]), 0.0)


if __name__ == "__main__":
    N, Cin, H, W, Hid = 2, 4, 16, 16, 8
    key = jax.random.PRNGKey(0)
    kx, kp_key = jax.random.split(key)
    # PyTorch module input is NCHW (2,4,16,16); we generate the NHWC equivalent.
    x = jax.random.normal(kx, (N, H, W, Cin), jnp.float32)

    raw = make_raw_params(kp_key, Cin, Hid)
    packed = pack_params(raw, W)

    out = jax.block_until_ready(dialate_even_down(x, packed))
    ref = jax.block_until_ready(reference(x, raw))

    # bf16 activations/weights on the MXU (f32 accumulation) -> loosened tolerance.
    np.testing.assert_allclose(np.asarray(out), np.asarray(ref), atol=3e-2, rtol=3e-2)

    print("KERNEL_OK")
</pallas_src>

<mosaic_0001>
module attributes {stable_mosaic.version = 11 : i64} {
  func.func @dilate_even_down_kernel(%arg0: i32, %arg1: memref<1x16x64xbf16, #tpu.memory_space<vmem>>, %arg2: memref<896x384xbf16, #tpu.memory_space<vmem>>, %arg3: memref<1x384xf32, #tpu.memory_space<vmem>>, %arg4: memref<384x128xbf16, #tpu.memory_space<vmem>>, %arg5: memref<1x128xf32, #tpu.memory_space<vmem>>, %arg6: memref<1x16x128xf32, #tpu.memory_space<vmem>>, %arg7: memref<28x128xbf16, #tpu.memory_space<vmem>>) attributes {dimension_semantics = [#tpu.dimension_semantics<parallel>], iteration_bounds = array<i64: 2>, scalar_prefetch = 0 : i64, scratch_operands = 1 : i64, tpu.core_type = #tpu.core_type<tc>, window_params = [{transform_indices = @transform_0, window_bounds = array<i64: 1, 16, 64>}, {pipeline_mode = #tpu.pipeline_mode<synchronous>, transform_indices = @transform_1, window_bounds = array<i64: 896, 384>}, {pipeline_mode = #tpu.pipeline_mode<synchronous>, transform_indices = @transform_2, window_bounds = array<i64: 1, 384>}, {pipeline_mode = #tpu.pipeline_mode<synchronous>, transform_indices = @transform_3, window_bounds = array<i64: 384, 128>}, {pipeline_mode = #tpu.pipeline_mode<synchronous>, transform_indices = @transform_4, window_bounds = array<i64: 1, 128>}, {transform_indices = @transform_5, window_bounds = array<i64: 1, 16, 128>}]} {
    %cst = arith.constant 0.000000e+00 : bf16
    %0 = vector.broadcast %cst : bf16 to vector<28x128xbf16>
    %c0 = arith.constant 0 : index
    %c0_0 = arith.constant 0 : index
    %1 = vector.load %arg7[%c0, %c0_0] : memref<28x128xbf16, #tpu.memory_space<vmem>>, vector<28x128xbf16>
    tpu.vector_store %arg7[%c0, %c0_0], %0 {strides = array<i32>} : memref<28x128xbf16, #tpu.memory_space<vmem>>, vector<28x128xbf16>,
    %c0_1 = arith.constant 0 : index
    %c0_2 = arith.constant 0 : index
    %c0_3 = arith.constant 0 : index
    %2 = vector.load %arg1[%c0_1, %c0_2, %c0_3] : memref<1x16x64xbf16, #tpu.memory_space<vmem>>, vector<1x16x64xbf16>
    %3 = vector.shape_cast %2 : vector<1x16x64xbf16> to vector<16x64xbf16>
    %cst_4 = arith.constant 0.000000e+00 : bf16
    %4 = vector.broadcast %cst_4 : bf16 to vector<16x64xbf16>
    %5 = arith.maximumf %3, %4 : vector<16x64xbf16>
    %c6 = arith.constant 6 : index
    %c24 = arith.constant 24 : index
    %6 = vector.load %arg7[%c6, %c24] : memref<28x128xbf16, #tpu.memory_space<vmem>>, vector<16x64xbf16>
    tpu.vector_store %arg7[%c6, %c24], %5 {strides = array<i32>} : memref<28x128xbf16, #tpu.memory_space<vmem>>, vector<16x64xbf16>,
    %c0_5 = arith.constant 0 : index
    %c0_6 = arith.constant 0 : index
    %7 = vector.load %arg7[%c0_5, %c0_6] : memref<28x128xbf16, #tpu.memory_space<vmem>>, vector<16x128xbf16>
    %c2 = arith.constant 2 : index
    %c0_7 = arith.constant 0 : index
    %8 = vector.load %arg7[%c2, %c0_7] : memref<28x128xbf16, #tpu.memory_space<vmem>>, vector<16x128xbf16>
    %c4 = arith.constant 4 : index
    %c0_8 = arith.constant 0 : index
    %9 = vector.load %arg7[%c4, %c0_8] : memref<28x128xbf16, #tpu.memory_space<vmem>>, vector<16x128xbf16>
    %c6_9 = arith.constant 6 : index
    %c0_10 = arith.constant 0 : index
    %10 = vector.load %arg7[%c6_9, %c0_10] : memref<28x128xbf16, #tpu.memory_space<vmem>>, vector<16x128xbf16>
    %c8 = arith.constant 8 : index
    %c0_11 = arith.constant 0 : index
    %11 = vector.load %arg7[%c8, %c0_11] : memref<28x128xbf16, #tpu.memory_space<vmem>>, vector<16x128xbf16>
    %c10 = arith.constant 10 : index
    %c0_12 = arith.constant 0 : index
    %12 = vector.load %arg7[%c10, %c0_12] : memref<28x128xbf16, #tpu.memory_space<vmem>>, vector<16x128xbf16>
    %c12 = arith.constant 12 : index
    %c0_13 = arith.constant 0 : index
    %13 = vector.load %arg7[%c12, %c0_13] : memref<28x128xbf16, #tpu.memory_space<vmem>>, vector<16x128xbf16>
    %14 = tpu.concatenate %7, %8, %9, %10, %11, %12, %13 in 1 : vector<16x128xbf16>, vector<16x128xbf16>, vector<16x128xbf16>, vector<16x128xbf16>, vector<16x128xbf16>, vector<16x128xbf16>, vector<16x128xbf16> -> vector<16x896xbf16>
    %c0_14 = arith.constant 0 : index
    %c0_15 = arith.constant 0 : index
    %15 = vector.load %arg2[%c0_14, %c0_15] : memref<896x384xbf16, #tpu.memory_space<vmem>>, vector<896x384xbf16>
    %cst_16 = arith.constant dense<0.000000e+00> : vector<16x384xf32>
    %16 = tpu.matmul %14, %15, %cst_16 {dimension_numbers = #tpu.dot_dimension_numbers<[1], [0], [0], [1], [0, 0, 1, 1], [], []>} : vector<16x896xbf16>, vector<896x384xbf16>, vector<16x384xf32> -> vector<16x384xf32>
    %c0_17 = arith.constant 0 : index
    %c0_18 = arith.constant 0 : index
    %17 = vector.load %arg3[%c0_17, %c0_18] : memref<1x384xf32, #tpu.memory_space<vmem>>, vector<1x384xf32>
    %18 = vector.broadcast %17 : vector<1x384xf32> to vector<16x384xf32>
    %19 = arith.addf %16, %18 : vector<16x384xf32>
    %cst_19 = arith.constant 0.000000e+00 : f32
    %20 = vector.broadcast %cst_19 : f32 to vector<16x384xf32>
    %21 = arith.maximumf %19, %20 : vector<16x384xf32>
    %22 = arith.truncf %21 : vector<16x384xf32> to vector<16x384xbf16>
    %c0_20 = arith.constant 0 : index
    %c0_21 = arith.constant 0 : index
    %23 = vector.load %arg4[%c0_20, %c0_21] : memref<384x128xbf16, #tpu.memory_space<vmem>>, vector<384x128xbf16>
    %cst_22 = arith.constant dense<0.000000e+00> : vector<16x128xf32>
    %24 = tpu.matmul %22, %23, %cst_22 {dimension_numbers = #tpu.dot_dimension_numbers<[1], [0], [0], [1], [0, 0, 1, 1], [], []>} : vector<16x384xbf16>, vector<384x128xbf16>, vector<16x128xf32> -> vector<16x128xf32>
    %c0_23 = arith.constant 0 : index
    %c0_24 = arith.constant 0 : index
    %25 = vector.load %arg5[%c0_23, %c0_24] : memref<1x128xf32, #tpu.memory_space<vmem>>, vector<1x128xf32>
    %26 = vector.broadcast %25 : vector<1x128xf32> to vector<16x128xf32>
    %27 = arith.addf %24, %26 : vector<16x128xf32>
    %cst_25 = arith.constant 0.000000e+00 : f32
    %28 = vector.broadcast %cst_25 : f32 to vector<16x128xf32>
    %29 = arith.maximumf %27, %28 : vector<16x128xf32>
    %c0_26 = arith.constant 0 : index
    %c0_27 = arith.constant 0 : index
    %c0_28 = arith.constant 0 : index
    %30 = vector.load %arg6[%c0_26, %c0_27, %c0_28] : memref<1x16x128xf32, #tpu.memory_space<vmem>>, vector<1x16x128xf32>
    %31 = vector.shape_cast %30 : vector<1x16x128xf32> to vector<16x128xf32>
    %32 = vector.shape_cast %29 : vector<16x128xf32> to vector<1x16x128xf32>
    tpu.vector_store %arg6[%c0_26, %c0_27, %c0_28], %32 {strides = array<i32>} : memref<1x16x128xf32, #tpu.memory_space<vmem>>, vector<1x16x128xf32>,
    return
  }
  func.func @transform_0(%arg0: i32) -> (i32, i32, i32) {
    %c0_i32 = arith.constant 0 : i32
    %c0_i32_0 = arith.constant 0 : i32
    %c0_i32_1 = arith.constant 0 : i32
    return %arg0, %c0_i32, %c0_i32_0 : i32, i32, i32
  }
  func.func @transform_1(%arg0: i32) -> (i32, i32) {
    %c0_i32 = arith.constant 0 : i32
    %c0_i32_0 = arith.constant 0 : i32
    %c0_i32_1 = arith.constant 0 : i32
    return %c0_i32, %c0_i32_0 : i32, i32
  }
  func.func @transform_2(%arg0: i32) -> (i32, i32) {
    %c0_i32 = arith.constant 0 : i32
    %c0_i32_0 = arith.constant 0 : i32
    %c0_i32_1 = arith.constant 0 : i32
    return %c0_i32, %c0_i32_0 : i32, i32
  }
  func.func @transform_3(%arg0: i32) -> (i32, i32) {
    %c0_i32 = arith.constant 0 : i32
    %c0_i32_0 = arith.constant 0 : i32
    %c0_i32_1 = arith.constant 0 : i32
    return %c0_i32, %c0_i32_0 : i32, i32
  }
  func.func @transform_4(%arg0: i32) -> (i32, i32) {
    %c0_i32 = arith.constant 0 : i32
    %c0_i32_0 = arith.constant 0 : i32
    %c0_i32_1 = arith.constant 0 : i32
    return %c0_i32, %c0_i32_0 : i32, i32
  }
  func.func @transform_5(%arg0: i32) -> (i32, i32, i32) {
    %c0_i32 = arith.constant 0 : i32
    %c0_i32_0 = arith.constant 0 : i32
    %c0_i32_1 = arith.constant 0 : i32
    return %arg0, %c0_i32, %c0_i32_0 : i32, i32, i32
  }
}

</mosaic_0001>

<bundles_post_ra>
// kernel: tpu_custom_call.1
= control target key start
LH: loop header
LB: loop body
LE: loop exit
PB: predicated region body
PF: predicated region fallthrough
CT: control target
= control target key end

     0   :  { %10 = vsyncpa [#allocation4], 0  ;;  %s3742_s0 = inlined_call_operand.hbm [shape: bf16[2,16,64], index: 0, kind: input, shape index: {}]   ;;  %s3743_s1 = inlined_call_operand.hbm [shape: bf16[896,384], index: 1, kind: input, shape index: {}]   ;;  %s3744_s2 = inlined_call_operand.hbm [shape: f32[1,384], index: 2, kind: input, shape index: {}]   ;;  %s3745_s3 = inlined_call_operand.hbm [shape: bf16[384,128], index: 3, kind: input, shape index: {}]   ;;  %s3746_s4 = inlined_call_operand.vmem [shape: f32[1,128], index: 4, kind: input, shape index: {}]   ;;  %s3747_s5 = inlined_call_operand.hbm [shape: f32[2,16,128], index: 5, kind: output, shape index: {}]  }
   0x1   :  { %12 = vsyncpa [#allocation4 + $0x1], 0 }
   0x2   :  { %13 = vsyncpa [#allocation7], 0 }
   0x3   :  { %14 = vsyncpa [#allocation10], 0 }
   0x4   :  { %15 = vsyncpa [#allocation5], 0 }
   0x5   :  { %17 = vsyncpa [#allocation5 + $0x1], 0  ;;  %s3511_s18 = smov 0   ;;  %s3513_s19 = smov 0  }
   0x6   :  { %s3515_s20 = smov 0   ;;  %s3517_s21 = smov 0  }
   0x7 LB: > { %s3532_s22 = sadd.s32 4294967295, %s3468_s21   ;;  %s2198_s23 = sadd.s32 4294967294, %s3468_s21   ;;  %s3468_s21 = sphi %s3517_s21, %s3762_s21   ;;  %s3464_s20 = sphi %s3515_s20, %s3761_s20   ;;  %s3460_s19 = sphi %s3513_s19, %s3760_s19   ;;  %s3456_s18 = sphi %s3511_s18, %s3759_s18  }
   0x8   : > { %p43_p0 = scmp.ne.s32.totalorder %s3460_s19, %s3456_s18  ;;  %p44_p1 = scmp.eq.s32.totalorder %s3532_s22, 0 }
   0x9   : > { %p151_p2 = scmp.eq.s32.totalorder %s3532_s22, 1  ;;  %p157_p3 = scmp.eq.s32.totalorder %s2198_s23, 1 }
   0xa   : > { %p3541_p4 = por %p44_p1, %p43_p0  ;;  %p2199_p5 = scmp.ge.s32.totalorder %s3468_s21, 1 }
   0xb   : > { %p3546_p6 = por %p157_p3, %p43_p0  ;;  %p164_p7 = scmp.lt.s32.totalorder %s3468_s21, 3 }
   0xc   : > { %s175_s28 = sshll.u32 %s3743_s1, 4  ;;  %s3470_s30 = smov [#allocation6]   ;;  %s176_s28 = int_to_ptr.hbm [resolvable:$true] %s175_s28 }
   0xd   : > { %p3554_p8 = pnand %p2199_p5, %p164_p7  ;;  %s177_s6 = sshll.u32 %s3470_s30, 4  ;;  %s178_s6 = int_to_ptr.vmem [resolvable:$true] %s177_s6 }
   0xe   : > { %s190_s10 = sshll.u32 %s3744_s2, 4  ;;  %s3471_s11 = smov 192   ;;  %s191_s10 = int_to_ptr.hbm [resolvable:$true] %s190_s10 }
   0xf   : > { %p3204_p9 = pneg %p3554_p8  ;;  %s3472_s12 = smov 12  }
  0x10   : > { %s3473_s13 = smov [#allocation8]   ;;  %s201_s17 = sshll.u32 %s3745_s3, 4  ;;  %s202_s17 = int_to_ptr.hbm [resolvable:$true] %s201_s17 }
  0x11   : > { %p3562_p10 = pnand %p3204_p9, %p44_p1  ;;  %s192_s14 = sshll.u32 %s3473_s13, 4  ;;  %s193_s14 = int_to_ptr.vmem [resolvable:$true] %s192_s14 }
  0x12   : > { %s3474_s23 = smov [#allocation9]   ;;  %s3748_s27 = smov 64  }
  0x13   : > { %3207 = dma.hbm_to_vmem [thread:$0]  (!%p3562_p10), %s176_s28, 21504, %s178_s6, [#allocation7], %s3471_s11, %s3471_s11, %s3472_s12  }
  0x14   : > { %3210 = dma.hbm_to_vmem [thread:$0]  (!%p3562_p10), %s191_s10, 48, %s193_s14, [#allocation7]  }
  0x15   : > { %s203_s26 = sshll.u32 %s3474_s23, 4  ;;  %s3476_s28 = smov 4   ;;  %s204_s26 = int_to_ptr.vmem [resolvable:$true] %s203_s26 }
  0x16   : > { %3213 = dma.hbm_to_vmem [thread:$0]  (!%p3562_p10), %s202_s17, 3072, %s204_s26, [#allocation10], %s3748_s27, %s3748_s27, %s3476_s28  }
  0x17   : > { %s3583_s30 = sadd.s32 1, %s3468_s21   ;;  %s30_s8 = sadd.s32 1, %s3464_s20 }
  0x18   : > { %s27_s6 = ssub.s32 %s3468_s21, %s3583_s30  ;;  %p37_p13 = scmp.ne.s32.totalorder %s3464_s20, %s3460_s19 }
  0x19   : > { %p28_p12 = scmp.eq.s32.totalorder %s27_s6, 0  ;;  %p38_p0 = scmp.eq.s32.totalorder %s3468_s21, 0 }
  0x1a   : > { %p3596_p3 = por %p151_p2, %p37_p13  ;;  %p3225_p5 = scmp.lt.s32.totalorder %s3468_s21, 2 }
  0x1b   : > { %s3592_s9 = scalar_select %p28_p12, %s3464_s20, %s30_s8  }
  0x1c   : > { %s220_s7 = sand.u32 1, %s3464_s20   ;;  %s2986_s11 = sshll.u32 %s3468_s21, 3 }
  0x1d   : > { %p39_p7 = por %p38_p0, %p37_p13  ;;  %s2204_s12 = sshll.u32 %s220_s7, 3 }
  0x1e   : > { %s229_s15 = scalar_lea.hbm %s3742_s0, %s2986_s11  ;;  %s224_s17 = scalar_lea.vmem [#allocation3], %s2204_s12 }
  0x1f   : > { %s230_s16 = sshll.u32 %s229_s15, 4  ;;  %s232_s23 = sshll.u32 %s224_s17, 4  ;;  %s231_s16 = int_to_ptr.hbm [resolvable:$true] %s230_s16  ;;  %s233_s23 = int_to_ptr.vmem [resolvable:$true] %s232_s23 }
  0x20   : > { %p3606_p9 = pnand %p3225_p5, %p39_p7  ;;  %s221_s6 = scalar_lea.sflag [#allocation4], %s220_s7 }
  0x21   : > { %s3364_s8 = sshra.s32 %s231_s16, 4  ;;  %s3371_s12 = scalar_lea.hbm %s3742_s0, 16  ;;  %s3365_s8 = int_to_ptr.hbm [resolvable:$true] %s3364_s8 }
  0x22   : > { %s3366_s27 = scalar_lea.hbm %s3365_s8, 8  ;;  %p3368_p10 = pneg %p3606_p9 }
  0x23   : > { %p3367_p2 = scmp.ne.s32.totalorder %s3365_s8, %s3366_s27  ;;  %p3372_p0 = scmp.lt.s32.totalorder %s3365_s8, %s3742_s0 }
  0x24   : > { %p3373_p5 = scmp.lt.s32.totalorder %s3371_s12, %s3366_s27 }
  0x25   : > { %p3369_p12 = pnand %p3368_p10, %p3367_p2 }
  0x26   : > { %p3374_p7 = por %p3373_p5, %p3372_p0 }
  0x27   : > { %p3370_p13 = pneg %p3369_p12 }
  0x29   : > { %p3375_p11 = pnand %p3374_p7, %p3370_p13 }
  0x2b   : > { %3378 = shalt.err (!%p3375_p11)
}
  0x2c   : > { %s3755_s7 = smov 64   ;;  %244 = sbr.rel (%p3554_p8) target bundleno = 611 (0x263), region = 40 }
  0x2d   : > { %3217 = dma.hbm_to_vmem [thread:$0]  (!%p3606_p9), %s231_s16, 128, %s233_s23, %s221_s6, %s3755_s7, %s3755_s7, %s3476_s28  }
  0x2e   : > { %s3626_s17 = sand.u32 (!%p3554_p8), 1, %s3460_s19  }
  0x2f   : > { %s2208_s8 = sshll.u32 (!%p3554_p8), %s3626_s17, 3  ;;  %s247_s27 = scalar_lea.sflag (!%p3554_p8), [#allocation4], %s3626_s17 }
  0x30   : > { %s250_s11 = scalar_lea.vmem (!%p3554_p8), [#allocation3], %s2208_s8 }
  0x31   : > { %3439 = dma.done.wait (%p3541_p4), %s247_s27, 128  }
  0x32   : > { %3441 = vsyncadd (%p3541_p4), %s247_s27, 4294967168 }
  0x33   : > { %3443 = dma.done.wait (%p44_p1), [#allocation7], 21552  }
  0x34   : > { %3445 = vsyncadd (%p44_p1), [#allocation7], 4294945744 }
  0x35   : > { %3447 = dma.done.wait (%p44_p1), [#allocation10], 3072  }
  0x36   : > { %3449 = vsyncadd (%p44_p1), [#allocation10], 4294964224  ;;  %vm308_vm0 = vcmask 1042432   ;;  %v3181_v0 = vld [vmem:[%s250_s11] sm:$0xff]   ;;  %vm309_vm1 = vcmask 1046532   ;;  %s3477_s24 = smov 24  }
  0x37   : > { %v2299_v1 = vld [vmem:[#allocation6 + $0xa8] sm:$0xf]  ;;  %v3009_v2 = vld [vmem:[#allocation6 + $0xb0] sm:$0xf0]  ;;  %v3182_v3 = vunpack.c.l.bf16 %v3181_v0  ;;  %v3183_v4 = vunpack.c.h.bf16 %v3181_v0  ;;  %v2287_v6 = vld [vmem:[#allocation6 + $0x90] sm:$0xf] }
  0x38   : > { %v2300_v5 = vor.u32 %v3009_v2, %v2299_v1  ;;  %v3006_v7 = vld [vmem:[#allocation6 + $0x98] sm:$0xf0]  ;;  %v2395_v8 = vld [vmem:[#allocation6 + $0x168] sm:$0xf]  ;;  %v3033_v10 = vld [vmem:[#allocation6 + $0x170] sm:$0xf0] }
  0x39   : > { %v2288_v9 = vor.u32 %v3006_v7, %v2287_v6  ;;  %v2491_v11 = vld [vmem:[#allocation6 + $0x228] sm:$0xf]  ;;  %v3057_v12 = vld [vmem:[#allocation6 + $0x230] sm:$0xf0]  ;;  %v302_v13 = vmax.f32 %v3182_v3, 0.0  ;;  %v303_v14 = vmax.f32 %v3183_v4, 0.0  ;;  %v2396_v15 = vor.u32 %v3033_v10, %v2395_v8  ;;  %vm3645_vm2 = vmor %vm308_vm0, %vm309_vm1 }
  0x3a   : > { %1535 = vmatpush.bf16.msra.mxu0 %v2300_v5  ;;  %v2492_v16 = vor.u32 %v3057_v12, %v2491_v11  ;;  %v2587_v17 = vld [vmem:[#allocation6 + $0x2e8] sm:$0xf]  ;;  %v3081_v18 = vld [vmem:[#allocation6 + $0x2f0] sm:$0xf0]  ;;  %v2275_v20 = vld [vmem:[#allocation6 + $0x78] sm:$0xf] }
  0x3b   : > { %v2588_v19 = vor.u32 %v3081_v18, %v2587_v17  ;;  %v3003_v21 = vld [vmem:[#allocation6 + $0x80] sm:$0xf0]  ;;  %v2383_v22 = vld [vmem:[#allocation6 + $0x150] sm:$0xf]  ;;  %v304_v23 = vpack.c.bf16 %v302_v13, %v302_v13  ;;  %v305_v24 = vpack.c.bf16 %v303_v14, %v303_v14  ;;  %1549 = vmatpush.bf16.msra.mxu1 %v2396_v15  ;;  %v3030_v25 = vld [vmem:[#allocation6 + $0x158] sm:$0xf0] }
  0x3c   : > { %1563 = vmatpush.bf16.msra.mxu2 %v2492_v16  ;;  %v2479_v26 = vld [vmem:[#allocation6 + $0x210] sm:$0xf]  ;;  %v3054_v27 = vld [vmem:[#allocation6 + $0x218] sm:$0xf0]  ;;  %v2384_v28 = vor.u32 %v3030_v25, %v2383_v22  ;;  %v2263_v32 = vld [vmem:[#allocation6 + $0x60] sm:$0xf]  ;;  %v2276_v35 = vor.u32 %v3003_v21, %v2275_v20 }
  0x3d   : > { %1577 = vmatpush.bf16.msra.mxu3 %v2588_v19  ;;  %v2480_v29 = vor.u32 %v3054_v27, %v2479_v26  ;;  %v2575_v30 = vld [vmem:[#allocation6 + $0x2d0] sm:$0xf]  ;;  %v3078_v31 = vld [vmem:[#allocation6 + $0x2d8] sm:$0xf0]  ;;  %v311_v33 = vrot.slane %v304_v23, 5  ;;  %v313_v34 = vrot.slane %v305_v24, 5 }
  0x3e   : > { %1536 = vmatpush.bf16.msra.mxu0 %v2288_v9  ;;  %v2576_v36 = vor.u32 %v3078_v31, %v2575_v30  ;;  %v3000_v37 = vld [vmem:[#allocation6 + $0x68] sm:$0xf0]  ;;  %v2371_v38 = vld [vmem:[#allocation6 + $0x138] sm:$0xf]  ;;  %v3027_v39 = vld [vmem:[#allocation6 + $0x140] sm:$0xf0] }
  0x3f   : > { %v2467_v40 = vld [vmem:[#allocation6 + $0x1f8] sm:$0xf]  ;;  %v3051_v41 = vld [vmem:[#allocation6 + $0x200] sm:$0xf0]  ;;  %316 = vrot.lane.b32.xlu0 %v311_v33, %s3477_s24  ;;  %v315_v42 = vrot.slane %v313_v34, 4  ;;  %1550 = vmatpush.bf16.msra.mxu1 %v2384_v28  ;;  %v2372_v43 = vor.u32 %v3027_v39, %v2371_v38  ;;  %v312_v46 = vrot.slane %v311_v33, 4  ;;  %v2264_v52 = vor.u32 %v3000_v37, %v2263_v32 }
  0x40   : > { %v2563_v44 = vld [vmem:[#allocation6 + $0x2b8] sm:$0xf]  ;;  %v3075_v45 = vld [vmem:[#allocation6 + $0x2c0] sm:$0xf0]  ;;  %1564 = vmatpush.bf16.msra.mxu2 %v2480_v29  ;;  %v2468_v48 = vor.u32 %v3051_v41, %v2467_v40  ;;  %v2251_v50 = vld [vmem:[#allocation6 + $0x48] sm:$0xf] }
  0x41   : > { %1578 = vmatpush.bf16.msra.mxu3 %v2576_v36  ;;  %v2564_v49 = vor.u32 %v3075_v45, %v2563_v44  ;;  %v2359_v51 = vld [vmem:[#allocation6 + $0x120] sm:$0xf]  ;;  %320 = vrot.lane.b32.xlu1 %v315_v42, %s3477_s24  ;;  %v3024_v53 = vld [vmem:[#allocation6 + $0x128] sm:$0xf0]  ;;  %v2997_v56 = vld [vmem:[#allocation6 + $0x50] sm:$0xf0]  ;;  %v314_v60 = vsel %vm3645_vm2, %v312_v46, %v313_v34 }
  0x42   : > { %1537 = vmatpush.bf16.msra.mxu0 %v2276_v35  ;;  %v2455_v54 = vld [vmem:[#allocation6 + $0x1e0] sm:$0xf]  ;;  %v3048_v55 = vld [vmem:[#allocation6 + $0x1e8] sm:$0xf0]  ;;  %v2360_v59 = vor.u32 %v3024_v53, %v2359_v51  ;;  %v2347_v63 = vld [vmem:[#allocation6 + $0x108] sm:$0xf]  ;;  %v2252_v2 = vor.u32 %v2997_v56, %v2251_v50 }
  0x43   : > { %v2551_v57 = vld [vmem:[#allocation6 + $0x2a0] sm:$0xf]  ;;  %v3072_v58 = vld [vmem:[#allocation6 + $0x2a8] sm:$0xf0]  ;;  %1551 = vmatpush.bf16.msra.mxu1 %v2372_v43  ;;  %v2456_v61 = vor.u32 %v3048_v55, %v2455_v54  ;;  %v3021_v0 = vld [vmem:[#allocation6 + $0x110] sm:$0xf0] }
  0x44   : > { %1565 = vmatpush.bf16.msra.mxu2 %v2468_v48  ;;  %v2552_v62 = vor.u32 %v3072_v58, %v2551_v57  ;;  %v2443_v1 = vld [vmem:[#allocation6 + $0x1c8] sm:$0xf]  ;;  %v3045_v3 = vld [vmem:[#allocation6 + $0x1d0] sm:$0xf0]  ;;  %v2239_v6 = vld [vmem:[#allocation6 + $0x30] sm:$0xf]  ;;  %v2348_v8 = vor.u32 %v3021_v0, %v2347_v63 }
  0x45   : > { %1579 = vmatpush.bf16.msra.mxu3 %v2564_v49  ;;  %v2539_v4 = vld [vmem:[#allocation6 + $0x288] sm:$0xf]  ;;  %v3069_v5 = vld [vmem:[#allocation6 + $0x290] sm:$0xf0]  ;;  %v2994_v7 = vld [vmem:[#allocation6 + $0x38] sm:$0xf0]  ;;  %v2444_v9 = vor.u32 %v3045_v3, %v2443_v1 }
  0x46   : > { %1538 = vmatpush.bf16.msra.mxu0 %v2264_v52  ;;  %v2540_v10 = vor.u32 %v3069_v5, %v2539_v4  ;;  %v2335_v11 = vld [vmem:[#allocation6 + $0xf0] sm:$0xf]  ;;  %v3018_v12 = vld [vmem:[#allocation6 + $0xf8] sm:$0xf0]  ;;  %v2240_v14 = vor.u32 %v2994_v7, %v2239_v6  ;;  %v2227_v18 = vld [vmem:[#allocation6 + $0x18] sm:$0xf] }
  0x47   : > { %318 = vrot.lane.b32.xlu0 %v314_v60, %s3477_s24  ;;  %1552 = vmatpush.bf16.msra.mxu1 %v2360_v59  ;;  %v2431_v13 = vld [vmem:[#allocation6 + $0x1b0] sm:$0xf]  ;;  %v3042_v15 = vld [vmem:[#allocation6 + $0x1b8] sm:$0xf0]  ;;  %v2991_v19 = vld [vmem:[#allocation6 + $0x20] sm:$0xf0]  ;;  %v2336_v20 = vor.u32 %v3018_v12, %v2335_v11 }
  0x48   : > { %1566 = vmatpush.bf16.msra.mxu2 %v2456_v61  ;;  %v2527_v16 = vld [vmem:[#allocation6 + $0x270] sm:$0xf]  ;;  %v3066_v17 = vld [vmem:[#allocation6 + $0x278] sm:$0xf0]  ;;  %v2432_v21 = vor.u32 %v3042_v15, %v2431_v13  ;;  %v2323_v23 = vld [vmem:[#allocation6 + $0xd8] sm:$0xf]  ;;  %v2228_v26 = vor.u32 %v2991_v19, %v2227_v18 }
  0x49   : > { %1580 = vmatpush.bf16.msra.mxu3 %v2552_v62  ;;  %v2528_v22 = vor.u32 %v3066_v17, %v2527_v16  ;;  %v3015_v24 = vld [vmem:[#allocation6 + $0xe0] sm:$0xf0]  ;;  %v2419_v25 = vld [vmem:[#allocation6 + $0x198] sm:$0xf]  ;;  %v2215_v30 = vld [vmem:[#allocation6] sm:$0xf] }
  0x4a   : > { %1539 = vmatpush.bf16.msra.mxu0 %v2252_v2  ;;  %v3039_v27 = vld [vmem:[#allocation6 + $0x1a0] sm:$0xf0]  ;;  %v2515_v28 = vld [vmem:[#allocation6 + $0x258] sm:$0xf]  ;;  %v2988_v31 = vld [vmem:[#allocation6 + $0x8] sm:$0xf0]  ;;  %v2324_v34 = vor.u32 %v3015_v24, %v2323_v23 }
  0x4b   : > { %1553 = vmatpush.bf16.msra.mxu1 %v2348_v8  ;;  %v3063_v29 = vld [vmem:[#allocation6 + $0x260] sm:$0xf0]  ;;  %v2683_v32 = vld [vmem:[#allocation6 + $0x3a8] sm:$0xf]  ;;  %v3105_v33 = vld [vmem:[#allocation6 + $0x3b0] sm:$0xf0]  ;;  %v2420_v37 = vor.u32 %v3039_v27, %v2419_v25  ;;  %v2216_v42 = vor.u32 %v2988_v31, %v2215_v30 }
  0x4c   : > { %1567 = vmatpush.bf16.msra.mxu2 %v2444_v9  ;;  %v2311_v35 = vld [vmem:[#allocation6 + $0xc0] sm:$0xf]  ;;  %v3012_v36 = vld [vmem:[#allocation6 + $0xc8] sm:$0xf0]  ;;  %v2516_v38 = vor.u32 %v3063_v29, %v2515_v28  ;;  %v2671_v43 = vld [vmem:[#allocation6 + $0x390] sm:$0xf]  ;;  %v2684_v48 = vor.u32 %v3105_v33, %v2683_v32 }
  0x4d   : > { %1581 = vmatpush.bf16.msra.mxu3 %v2540_v10  ;;  %v2407_v39 = vld [vmem:[#allocation6 + $0x180] sm:$0xf]  ;;  %v3036_v40 = vld [vmem:[#allocation6 + $0x188] sm:$0xf0]  ;;  %v3102_v44 = vld [vmem:[#allocation6 + $0x398] sm:$0xf0]  ;;  %v2312_v52 = vor.u32 %v3012_v36, %v2311_v35 }
  0x4e   : > { %1540 = vmatpush.bf16.msra.mxu0 %v2240_v14  ;;  %v2503_v41 = vld [vmem:[#allocation6 + $0x240] sm:$0xf]  ;;  %v3060_v45 = vld [vmem:[#allocation6 + $0x248] sm:$0xf0]  ;;  %v2779_v46 = vld [vmem:[#allocation6 + $0x468] sm:$0xf]  ;;  %v2408_v54 = vor.u32 %v3036_v40, %v2407_v39  ;;  %v2672_v63 = vor.u32 %v3102_v44, %v2671_v43 }
  0x4f   : > { %1554 = vmatpush.bf16.msra.mxu1 %v2336_v20  ;;  %v3129_v47 = vld [vmem:[#allocation6 + $0x470] sm:$0xf0]  ;;  %v2875_v49 = vld [vmem:[#allocation6 + $0x528] sm:$0xf]  ;;  %v3008_v51 = vld [vmem:[#allocation6 + $0xac] sm:$0xf]  ;;  %v2504_v55 = vor.u32 %v3060_v45, %v2503_v41 }
  0x50   : > { %1568 = vmatpush.bf16.msra.mxu2 %v2432_v21  ;;  %v3153_v50 = vld [vmem:[#allocation6 + $0x530] sm:$0xf0]  ;;  %v2301_v53 = vld [vmem:[#allocation6 + $0xb4] sm:$0xf0]  ;;  %v3478_v56 = vmov 0   ;;  %v2780_v57 = vor.u32 %v3129_v47, %v2779_v46  ;;  %vm325_vm3 = vcmask 715971  }
  0x51   : > { %1582 = vmatpush.bf16.msra.mxu3 %v2528_v22  ;;  %294 = vst [vmem:[#allocation2] sm:$0xf] %v3478_v56  ;;  %v2876_v58 = vor.u32 %v3153_v50, %v2875_v49  ;;  %v2659_v59 = vld [vmem:[#allocation6 + $0x378] sm:$0xf]  ;;  %v3099_v60 = vld [vmem:[#allocation6 + $0x380] sm:$0xf0]  ;;  %v2304_v0 = vor.u32 %v3008_v51, %v2301_v53 }
  0x52   : > { %1541 = vmatpush.bf16.msra.mxu0 %v2228_v26  ;;  %v2767_v61 = vld [vmem:[#allocation6 + $0x450] sm:$0xf]  ;;  %v3126_v62 = vld [vmem:[#allocation6 + $0x458] sm:$0xf0]  ;;  %297 = vst [vmem:[#allocation2 + $0xc] sm:$0x3] %v3478_v56  ;;  %v2660_v7 = vor.u32 %v3099_v60, %v2659_v59 }
  0x53   : > { %1555 = vmatpush.bf16.msra.mxu1 %v2324_v34  ;;  %v2863_v1 = vld [vmem:[#allocation6 + $0x510] sm:$0xf]  ;;  %v3150_v2 = vld [vmem:[#allocation6 + $0x518] sm:$0xf0]  ;;  %295 = vst [vmem:[#allocation2 + $0x4] sm:$0xf] %v3478_v56  ;;  %v2768_v5 = vor.u32 %v3126_v62, %v2767_v61 }
  0x54   : > { %1569 = vmatpush.bf16.msra.mxu2 %v2420_v37  ;;  %v3005_v3 = vld [vmem:[#allocation6 + $0x94] sm:$0xf]  ;;  %v2289_v4 = vld [vmem:[#allocation6 + $0x9c] sm:$0xf0]  ;;  %296 = vst [vmem:[#allocation2 + $0x8] sm:$0xf] %v3478_v56  ;;  %v2864_v6 = vor.u32 %v3150_v2, %v2863_v1 }
  0x55   : > { %1583 = vmatpush.bf16.msra.mxu3 %v2516_v38  ;;  %v2292_v8 = vor.u32 %v3005_v3, %v2289_v4  ;;  %v2647_v9 = vld [vmem:[#allocation6 + $0x360] sm:$0xf]  ;;  %v3096_v10 = vld [vmem:[#allocation6 + $0x368] sm:$0xf0]  ;;  %v2755_v12 = vld [vmem:[#allocation6 + $0x438] sm:$0xf] }
  0x56   : > { %1542 = vmatpush.bf16.msra.mxu0 %v2216_v42  ;;  %v2648_v11 = vor.u32 %v3096_v10, %v2647_v9  ;;  %v3123_v13 = vld [vmem:[#allocation6 + $0x440] sm:$0xf0]  ;;  %v2851_v14 = vld [vmem:[#allocation6 + $0x4f8] sm:$0xf]  ;;  %v3002_v17 = vld [vmem:[#allocation6 + $0x7c] sm:$0xf] }
  0x57   : > { %1556 = vmatpush.bf16.msra.mxu1 %v2312_v52  ;;  %v2756_v15 = vor.u32 %v3123_v13, %v2755_v12  ;;  %v3147_v16 = vld [vmem:[#allocation6 + $0x500] sm:$0xf0]  ;;  %v2277_v18 = vld [vmem:[#allocation6 + $0x84] sm:$0xf0]  ;;  %v3093_v22 = vld [vmem:[#allocation6 + $0x350] sm:$0xf0] }
  0x58   : > { %1570 = vmatpush.bf16.msra.mxu2 %v2408_v54  ;;  %v2852_v19 = vor.u32 %v3147_v16, %v2851_v14  ;;  %v2280_v20 = vor.u32 %v3002_v17, %v2277_v18  ;;  %v2635_v21 = vld [vmem:[#allocation6 + $0x348] sm:$0xf]  ;;  %v2743_v23 = vld [vmem:[#allocation6 + $0x420] sm:$0xf]  ;;  %v3120_v25 = vld [vmem:[#allocation6 + $0x428] sm:$0xf0] }
  0x59   : > { %1584 = vmatpush.bf16.msra.mxu3 %v2504_v55  ;;  %v2636_v24 = vor.u32 %v3093_v22, %v2635_v21  ;;  %v2839_v26 = vld [vmem:[#allocation6 + $0x4e0] sm:$0xf]  ;;  %v3144_v27 = vld [vmem:[#allocation6 + $0x4e8] sm:$0xf0]  ;;  %v2744_v28 = vor.u32 %v3120_v25, %v2743_v23  ;;  %v2999_v30 = vld [vmem:[#allocation6 + $0x64] sm:$0xf] }
  0x5a   : > { %1591 = vmatpush.bf16.msrb.mxu0 %v2684_v48  ;;  %v2840_v29 = vor.u32 %v3144_v27, %v2839_v26  ;;  %v2265_v31 = vld [vmem:[#allocation6 + $0x6c] sm:$0xf0]  ;;  %v3090_v34 = vld [vmem:[#allocation6 + $0x338] sm:$0xf0]  ;;  %v2731_v36 = vld [vmem:[#allocation6 + $0x408] sm:$0xf] }
  0x5b   : > { %1605 = vmatpush.bf16.msrb.mxu1 %v2780_v57  ;;  %v2623_v32 = vld [vmem:[#allocation6 + $0x330] sm:$0xf]  ;;  %v2268_v33 = vor.u32 %v2999_v30, %v2265_v31  ;;  %v3117_v37 = vld [vmem:[#allocation6 + $0x410] sm:$0xf0]  ;;  %v2827_v38 = vld [vmem:[#allocation6 + $0x4c8] sm:$0xf] }
  0x5c   : > { %1619 = vmatpush.bf16.msrb.mxu2 %v2876_v58  ;;  %v2624_v35 = vor.u32 %v3090_v34, %v2623_v32  ;;  %v2732_v39 = vor.u32 %v3117_v37, %v2731_v36  ;;  %v3141_v40 = vld [vmem:[#allocation6 + $0x4d0] sm:$0xf0]  ;;  %v2996_v41 = vld [vmem:[#allocation6 + $0x4c] sm:$0xf]  ;;  %v2253_v42 = vld [vmem:[#allocation6 + $0x54] sm:$0xf0] }
  0x5d   : > { %1633 = vmatpush.bf16.msrb.mxu3 %v2304_v0  ;;  %v2828_v43 = vor.u32 %v3141_v40, %v2827_v38  ;;  %v2256_v44 = vor.u32 %v2996_v41, %v2253_v42  ;;  %v2611_v45 = vld [vmem:[#allocation6 + $0x318] sm:$0xf]  ;;  %v3087_v46 = vld [vmem:[#allocation6 + $0x320] sm:$0xf0]  ;;  %v2719_v47 = vld [vmem:[#allocation6 + $0x3f0] sm:$0xf] }
  0x5e   : > { %1592 = vmatpush.bf16.msrb.mxu0 %v2672_v63  ;;  %v2612_v48 = vor.u32 %v3087_v46, %v2611_v45  ;;  %v3114_v49 = vld [vmem:[#allocation6 + $0x3f8] sm:$0xf0]  ;;  %v2815_v50 = vld [vmem:[#allocation6 + $0x4b0] sm:$0xf]  ;;  %v2993_v54 = vld [vmem:[#allocation6 + $0x34] sm:$0xf] }
  0x5f   : > { %1606 = vmatpush.bf16.msrb.mxu1 %v2768_v5  ;;  %v3138_v51 = vld [vmem:[#allocation6 + $0x4b8] sm:$0xf0]  ;;  %v2720_v52 = vor.u32 %v3114_v49, %v2719_v47  ;;  %v2241_v55 = vld [vmem:[#allocation6 + $0x3c] sm:$0xf0]  ;;  %v3084_v58 = vld [vmem:[#allocation6 + $0x308] sm:$0xf0] }
  0x60   : > { %1620 = vmatpush.bf16.msrb.mxu2 %v2864_v6  ;;  %v2816_v53 = vor.u32 %v3138_v51, %v2815_v50  ;;  %v2599_v56 = vld [vmem:[#allocation6 + $0x300] sm:$0xf]  ;;  %v2244_v57 = vor.u32 %v2993_v54, %v2241_v55  ;;  %v2707_v60 = vld [vmem:[#allocation6 + $0x3d8] sm:$0xf]  ;;  %v3111_v61 = vld [vmem:[#allocation6 + $0x3e0] sm:$0xf0] }
  0x61   : > { %1634 = vmatpush.bf16.msrb.mxu3 %v2292_v8  ;;  %v2600_v59 = vor.u32 %v3084_v58, %v2599_v56  ;;  %v2803_v62 = vld [vmem:[#allocation6 + $0x498] sm:$0xf]  ;;  %v2708_v63 = vor.u32 %v3111_v61, %v2707_v60  ;;  %v3135_v0 = vld [vmem:[#allocation6 + $0x4a0] sm:$0xf0]  ;;  %v2990_v1 = vld [vmem:[#allocation6 + $0x1c] sm:$0xf] }
  0x62   : > { %1593 = vmatpush.bf16.msrb.mxu0 %v2660_v7  ;;  %v2229_v2 = vld [vmem:[#allocation6 + $0x24] sm:$0xf0]  ;;  %v2804_v3 = vor.u32 %v3135_v0, %v2803_v62  ;;  %v2695_v5 = vld [vmem:[#allocation6 + $0x3c0] sm:$0xf]  ;;  %v3108_v6 = vld [vmem:[#allocation6 + $0x3c8] sm:$0xf0] }
  0x63   : > { %1607 = vmatpush.bf16.msrb.mxu1 %v2756_v15  ;;  %v2232_v4 = vor.u32 %v2990_v1, %v2229_v2  ;;  %v2791_v7 = vld [vmem:[#allocation6 + $0x480] sm:$0xf]  ;;  %v2696_v8 = vor.u32 %v3108_v6, %v2695_v5  ;;  %v3132_v9 = vld [vmem:[#allocation6 + $0x488] sm:$0xf0]  ;;  %v2987_v10 = vld [vmem:[#allocation6 + $0x4] sm:$0xf] }
  0x64   : > { %1621 = vmatpush.bf16.msrb.mxu2 %v2852_v19  ;;  %v2792_v12 = vor.u32 %v3132_v9, %v2791_v7  ;;  %vm329_vm4 = vcmask 714944   ;;  %vm327_vm5 = vcmask 715968   ;;  %v2397_v21 = vld [vmem:[#allocation6 + $0x174] sm:$0xf0]  ;;  %v3029_v31 = vld [vmem:[#allocation6 + $0x154] sm:$0xf] }
  0x65   : > { %1635 = vmatpush.bf16.msrb.mxu3 %v2280_v20  ;;  %v3032_v20 = vld [vmem:[#allocation6 + $0x16c] sm:$0xf]  ;;  %v2385_v32 = vld [vmem:[#allocation6 + $0x15c] sm:$0xf0]  ;;  %vm356_vm6 = vcmask 1046528   ;;  %vm367_vm7 = vcmask 1045504  }
  0x66   : > { %1594 = vmatpush.bf16.msrb.mxu0 %v2648_v11  ;;  %v2217_v11 = vld [vmem:[#allocation6 + $0xc] sm:$0xf0]  ;;  %v2400_v25 = vor.u32 %v3032_v20, %v2397_v21  ;;  %vm378_vm8 = vcmask 1044480   ;;  %v2493_v40 = vld [vmem:[#allocation6 + $0x234] sm:$0xf0]  ;;  %v2388_v41 = vor.u32 %v3029_v31, %v2385_v32  ;;  %s2212_s16 = sshll.u32 %s3626_s17, 4 }
  0x67   : > { %1608 = vmatpush.bf16.msrb.mxu1 %v2744_v28  ;;  %v2220_v13 = vor.u32 %v2987_v10, %v2217_v11  ;;  %v2589_v45 = vld [vmem:[#allocation6 + $0x2f4] sm:$0xf0]  ;;  %v3104_v50 = vld [vmem:[#allocation6 + $0x3ac] sm:$0xf]  ;;  %v3053_v54 = vld [vmem:[#allocation6 + $0x214] sm:$0xf] }
  0x68   : > { %1622 = vmatpush.bf16.msrb.mxu2 %v2840_v29  ;;  %v2685_v51 = vld [vmem:[#allocation6 + $0x3b4] sm:$0xf0]  ;;  %v341_v55 = vld [vmem:[#allocation2 + $0xc] sm:$0x1]  ;;  %v2481_v61 = vld [vmem:[#allocation6 + $0x21c] sm:$0xf0] }
  0x69   : > { %1636 = vmatpush.bf16.msrb.mxu3 %v2268_v33  ;;  %v343_v56 = vld [vmem:[#allocation2 + $0xc] sm:$0x3]  ;;  %v3077_v0 = vld [vmem:[#allocation6 + $0x2d4] sm:$0xf]  ;;  %v2577_v1 = vld [vmem:[#allocation6 + $0x2dc] sm:$0xf0] }
  0x6a   : > { %1595 = vmatpush.bf16.msrb.mxu0 %v2636_v24  ;;  %v3101_v2 = vld [vmem:[#allocation6 + $0x394] sm:$0xf]  ;;  %v2673_v7 = vld [vmem:[#allocation6 + $0x39c] sm:$0xf0]  ;;  %v2361_v9 = vld [vmem:[#allocation6 + $0x12c] sm:$0xf0] }
  0x6b   : > { %1609 = vmatpush.bf16.msrb.mxu1 %v2732_v39  ;;  %v3056_v39 = vld [vmem:[#allocation6 + $0x22c] sm:$0xf]  ;;  %v3074_v20 = vld [vmem:[#allocation6 + $0x2bc] sm:$0xf]  ;;  %s3179_s23 = sshll.u32 %s3532_s22, 4  ;;  %s292_s12 = scalar_lea.vmem [#allocation11], %s2212_s16 }
  0x6c   : > { %1623 = vmatpush.bf16.msrb.mxu2 %v2828_v43  ;;  %v2496_v60 = vor.u32 %v3056_v39, %v2493_v40  ;;  %v3071_v39 = vld [vmem:[#allocation6 + $0x2a4] sm:$0xf]  ;;  %s2092_s13 = scalar_lea.hbm %s3747_s5, %s3179_s23  ;;  %s2093_s14 = sshll.u32 %s292_s12, 4  ;;  %s2094_s14 = int_to_ptr.vmem [resolvable:$true] %s2093_s14 }
  0x6d   : > { %1637 = vmatpush.bf16.msrb.mxu3 %v2256_v44  ;;  %v3080_v44 = vld [vmem:[#allocation6 + $0x2ec] sm:$0xf]  ;;  %s2095_s15 = sshll.u32 %s2092_s13, 4  ;;  %s2081_s22 = scalar_lea.sflag [#allocation5], %s3626_s17  ;;  %s2096_s15 = int_to_ptr.hbm [resolvable:$true] %s2095_s15 }
  0x6e   : > { %1596 = vmatpush.bf16.msrb.mxu0 %v2624_v35  ;;  %v2592_v62 = vor.u32 %v3080_v44, %v2589_v45  ;;  %v2649_v44 = vld [vmem:[#allocation6 + $0x36c] sm:$0xf0]  ;;  %s3408_s7 = sshra.s32 %s2096_s15, 4  ;;  %s3414_s24 = scalar_lea.hbm %s3747_s5, 32  ;;  %s3409_s7 = int_to_ptr.hbm [resolvable:$true] %s3408_s7 }
  0x6f   : > { %1610 = vmatpush.bf16.msrb.mxu1 %v2720_v52  ;;  %v3026_v52 = vld [vmem:[#allocation6 + $0x13c] sm:$0xf]  ;;  %s3410_s8 = scalar_lea.hbm %s3409_s7, 16  ;;  %p3415_p11 = scmp.lt.s32.totalorder %s3409_s7, %s3747_s5 }
  0x70   : > { %1624 = vmatpush.bf16.msrb.mxu2 %v2816_v53  ;;  %v2373_v53 = vld [vmem:[#allocation6 + $0x144] sm:$0xf0]  ;;  %p3411_p1 = scmp.ne.s32.totalorder %s3409_s7, %s3410_s8  ;;  %p3416_p9 = scmp.lt.s32.totalorder %s3414_s24, %s3410_s8 }
  0x71   : > { %1638 = vmatpush.bf16.msrb.mxu3 %v2244_v57  ;;  %v2376_v6 = vor.u32 %v3026_v52, %v2373_v53  ;;  %v3044_v52 = vld [vmem:[#allocation6 + $0x1cc] sm:$0xf] }
  0x72   : > { %1597 = vmatpush.bf16.msrb.mxu0 %v2612_v48  ;;  %p3412_p4 = pnand %p3411_p1, %p3596_p3  ;;  %p3417_p2 = por %p3416_p9, %p3415_p11 }
  0x73   : > { %1611 = vmatpush.bf16.msrb.mxu1 %v2708_v63  ;;  %v2688_v63 = vor.u32 %v3104_v50, %v2685_v51 }
  0x74   : > { %1625 = vmatpush.bf16.msrb.mxu2 %v2804_v3  ;;  %p3413_p8 = pneg %p3412_p4 }
  0x75   : > { %1639 = vmatpush.bf16.msrb.mxu3 %v2232_v4 }
  0x76   : > { %1598 = vmatpush.bf16.msrb.mxu0 %v2600_v59  ;;  %p3418_p10 = pnand %p3417_p2, %p3413_p8 }
  0x77   : > { %1612 = vmatpush.bf16.msrb.mxu1 %v2696_v8  ;;  %v3023_v8 = vld [vmem:[#allocation6 + $0x124] sm:$0xf] }
  0x78   : > { %1626 = vmatpush.bf16.msrb.mxu2 %v2792_v12  ;;  %v2364_v21 = vor.u32 %v3023_v8, %v2361_v9  ;;  %v3065_v8 = vld [vmem:[#allocation6 + $0x274] sm:$0xf] }
  0x79   : > { %1640 = vmatpush.bf16.msrb.mxu3 %v2220_v13  ;;  %v2484_v13 = vor.u32 %v3053_v54, %v2481_v61  ;;  %v2445_v54 = vld [vmem:[#allocation6 + $0x1d4] sm:$0xf0] }
  0x7a   : > { %v2637_v61 = vld [vmem:[#allocation6 + $0x354] sm:$0xf0] }
  0xb1   : > { %v317_v14 = vpop.permute.xlu0 %316 }
  0xb2   : > { %326 = vst.msk [vmem:[#allocation2] sm:$0x8] %vm325_vm3, %v317_v14  ;;  %v390_v14 = vunpack.c.l.b16 %v341_v55  ;;  %v3068_v55 = vld [vmem:[#allocation6 + $0x28c] sm:$0xf] }
  0xb3   : > { %v321_v15 = vpop.permute.xlu1 %320 }
  0xb4   : > { %330 = vst.msk [vmem:[#allocation2 + $0x8] sm:$0x7] %vm329_vm4, %v321_v15  ;;  %v400_v15 = vunpack.c.l.b16 %v343_v56  ;;  %v392_v31 = vpack.c.b16 %v390_v14, %v390_v14  ;;  %v2541_v56 = vld [vmem:[#allocation6 + $0x294] sm:$0xf0]  ;;  %v2625_v14 = vld [vmem:[#allocation6 + $0x33c] sm:$0xf0] }
  0xb6   : > { %v402_v32 = vpack.c.b16 %v400_v15, %v400_v15  ;;  %v394_v50 = vrot.slane %v392_v31, 1  ;;  %v3011_v15 = vld [vmem:[#allocation6 + $0xc4] sm:$0xf] }
  0xb8   : > { %v404_v51 = vrot.slane %v402_v32, 2  ;;  %v2769_v32 = vld [vmem:[#allocation6 + $0x45c] sm:$0xf0] }
  0xb9   : > { %v319_v16 = vpop.permute.xlu0 %318  ;;  %v333_v26 = vld [vmem:[#allocation2] sm:$0xe] }
  0xba   : > { %328 = vst.msk [vmem:[#allocation2 + $0x4] sm:$0xf] %vm327_vm5, %v319_v16  ;;  %v335_v28 = vld [vmem:[#allocation2] sm:$0xc]  ;;  %v352_v36 = vunpack.c.l.b16 %v333_v26  ;;  %v2580_v16 = vor.u32 %v3077_v0, %v2577_v1  ;;  %v2448_v0 = vor.u32 %v3044_v52, %v2445_v54  ;;  %v2544_v1 = vor.u32 %v3068_v55, %v2541_v56  ;;  %v3122_v52 = vld [vmem:[#allocation6 + $0x43c] sm:$0xf] }
  0xbb   : > { %v334_v17 = vld [vmem:[#allocation2 + $0x8] sm:$0x1]  ;;  %v337_v30 = vld [vmem:[#allocation2] sm:$0x8]  ;;  %v363_v37 = vunpack.c.l.b16 %v335_v28  ;;  %v3020_v28 = vld [vmem:[#allocation6 + $0x10c] sm:$0xf] }
  0xbc   : > { %v336_v18 = vld [vmem:[#allocation2 + $0x8] sm:$0x3]  ;;  %v353_v22 = vunpack.c.l.b16 %v334_v17  ;;  %v374_v38 = vunpack.c.l.b16 %v337_v30  ;;  %v2676_v17 = vor.u32 %v3101_v2, %v2673_v7  ;;  %v2433_v7 = vld [vmem:[#allocation6 + $0x1bc] sm:$0xf0] }
  0xbd   : > { %v338_v19 = vld [vmem:[#allocation2 + $0x8] sm:$0x7]  ;;  %v364_v23 = vunpack.c.l.b16 %v336_v18  ;;  %v3050_v18 = vld [vmem:[#allocation6 + $0x1fc] sm:$0xf] }
  0xbe   : > { %v375_v24 = vunpack.c.l.b16 %v338_v19  ;;  %v355_v27 = vpack.c.b16 %v353_v22, %v353_v22  ;;  %v339_v10 = vld [vmem:[#allocation2 + $0x8] sm:$0xf] }
  0xbf   : > { %v366_v29 = vpack.c.b16 %v364_v23, %v364_v23  ;;  %v2469_v19 = vld [vmem:[#allocation6 + $0x204] sm:$0xf0]  ;;  %v3098_v23 = vld [vmem:[#allocation6 + $0x37c] sm:$0xf] }
  0xc0   : > { %v377_v33 = vpack.c.b16 %v375_v24, %v375_v24  ;;  %v358_v42 = vrot.slane %v355_v27, 1  ;;  %v2565_v22 = vld [vmem:[#allocation6 + $0x2c4] sm:$0xf0]  ;;  %v2472_v30 = vor.u32 %v3050_v18, %v2469_v19  ;;  %v3128_v18 = vld [vmem:[#allocation6 + $0x46c] sm:$0xf] }
  0xc1   : > { %v3653_v34 = vld [vmem:[#allocation2] sm:$0xff]   ;;  %v369_v43 = vrot.slane %v366_v29, 2  ;;  %v2661_v24 = vld [vmem:[#allocation6 + $0x384] sm:$0xf0]  ;;  %v2349_v29 = vld [vmem:[#allocation6 + $0x114] sm:$0xf0] }
  0xc2   : > { %v3656_v35 = vunpack.c.h.b16 %v3653_v34  ;;  %1543 = vmatmul.bf16.vlgmr.msra.gmra.mxu0 %v3653_v34  ;;  %v380_v49 = vrot.slane %v377_v33, 3  ;;  %v340_v11 = vld [vmem:[#allocation2 + $0x4] sm:$0xe]  ;;  %v2568_v33 = vor.u32 %v3074_v20, %v2565_v22  ;;  %v2781_v19 = vld [vmem:[#allocation6 + $0x474] sm:$0xf0] }
  0xc3   : > { %1647 = vmatpush.bf16.msra.mxu0 %v2400_v25  ;;  %v342_v12 = vld [vmem:[#allocation2 + $0x4] sm:$0xc]  ;;  %v384_v25 = vunpack.c.l.b16 %v339_v10  ;;  %v389_v26 = vunpack.c.l.b16 %v340_v11  ;;  %v3038_v22 = vld [vmem:[#allocation6 + $0x19c] sm:$0xf] }
  0xc4   : > { %v354_v46 = vpack.c.b16 %v3656_v35, %v352_v36  ;;  %v365_v47 = vpack.c.b16 %v3656_v35, %v363_v37  ;;  %v376_v48 = vpack.c.b16 %v3656_v35, %v374_v38  ;;  %v399_v27 = vunpack.c.l.b16 %v342_v12  ;;  %v3047_v37 = vld [vmem:[#allocation6 + $0x1e4] sm:$0xf]  ;;  %v2457_v38 = vld [vmem:[#allocation6 + $0x1ec] sm:$0xf0]  ;;  %v2529_v12 = vld [vmem:[#allocation6 + $0x27c] sm:$0xf0] }
  0xc5   : > { %v2664_v36 = vor.u32 %v3098_v23, %v2661_v24  ;;  %v3675_v40 = vpack.c.b16 %v384_v25, %v3656_v35  ;;  %v391_v45 = vpack.c.b16 %v384_v25, %v389_v26  ;;  %v2532_v20 = vor.u32 %v3065_v8, %v2529_v12  ;;  %v2421_v23 = vld [vmem:[#allocation6 + $0x1a4] sm:$0xf0]  ;;  %v3062_v24 = vld [vmem:[#allocation6 + $0x25c] sm:$0xf] }
  0xc6   : > { %v357_v57 = vrot.slane %v354_v46, 1  ;;  %v368_v58 = vrot.slane %v365_v47, 2  ;;  %v379_v59 = vrot.slane %v376_v48, 3  ;;  %v401_v46 = vpack.c.b16 %v384_v25, %v399_v27  ;;  %v3017_v47 = vld [vmem:[#allocation6 + $0xf4] sm:$0xf] }
  0xc7   : > { %1648 = vmatpush.bf16.msra.mxu0 %v2388_v41  ;;  %v2352_v41 = vor.u32 %v3020_v28, %v2349_v29  ;;  %v2337_v48 = vld [vmem:[#allocation6 + $0xfc] sm:$0xf0]  ;;  %v2517_v26 = vld [vmem:[#allocation6 + $0x264] sm:$0xf0]  ;;  %v3086_v27 = vld [vmem:[#allocation6 + $0x31c] sm:$0xf]  ;;  %v2784_v29 = vor.u32 %v3128_v18, %v2781_v19  ;;  %v2424_v31 = vor.u32 %v3038_v22, %v2421_v23 }
  0xc8   : > { %v3663_v3 = vsel %vm356_vm6, %v357_v57, %v358_v42  ;;  %v3666_v4 = vsel %vm367_vm7, %v368_v58, %v369_v43  ;;  %v3669_v5 = vsel %vm378_vm8, %v379_v59, %v380_v49  ;;  %v2553_v42 = vld [vmem:[#allocation6 + $0x2ac] sm:$0xf0]  ;;  %v3095_v43 = vld [vmem:[#allocation6 + $0x364] sm:$0xf]  ;;  %v2460_v49 = vor.u32 %v3047_v37, %v2457_v38  ;;  %v2613_v28 = vld [vmem:[#allocation6 + $0x324] sm:$0xf0] }
  0xc9   : > { %1557 = vmatmul.bf16.vlgmr.msra.gmra.mxu1 %v3663_v3  ;;  %1571 = vmatmul.bf16.vlgmr.msra.gmra.mxu2 %v3666_v4  ;;  %v2556_v53 = vor.u32 %v3071_v39, %v2553_v42  ;;  %v2652_v35 = vor.u32 %v3095_v43, %v2649_v44  ;;  %v2340_v57 = vor.u32 %v3017_v47, %v2337_v48  ;;  %v393_v58 = vrot.slane %v391_v45, 1  ;;  %v3059_v39 = vld [vmem:[#allocation6 + $0x244] sm:$0xf]  ;;  %v2601_v43 = vld [vmem:[#allocation6 + $0x30c] sm:$0xf0] }
  0xca   : > { %1585 = vmatmul.bf16.vlgmr.msra.gmra.mxu3 %v3669_v5  ;;  %1661 = vmatpush.bf16.msra.mxu1 %v2496_v60  ;;  %v403_v59 = vrot.slane %v401_v46, 2  ;;  %v3092_v60 = vld [vmem:[#allocation6 + $0x34c] sm:$0xf]  ;;  %v2520_v37 = vor.u32 %v3062_v24, %v2517_v26  ;;  %v2616_v38 = vor.u32 %v3086_v27, %v2613_v28  ;;  %v3083_v42 = vld [vmem:[#allocation6 + $0x304] sm:$0xf] }
  0xcb   : > { %1675 = vmatpush.bf16.msra.mxu2 %v2592_v62  ;;  %1689 = vmatpush.bf16.msra.mxu3 %v2688_v63  ;;  %v3014_v62 = vld [vmem:[#allocation6 + $0xdc] sm:$0xf]  ;;  %v2325_v63 = vld [vmem:[#allocation6 + $0xe4] sm:$0xf0]  ;;  %v2640_v2 = vor.u32 %v3092_v60, %v2637_v61  ;;  %v3679_v9 = vsel %vm356_vm6, %v393_v58, %v394_v50  ;;  %v3152_v44 = vld [vmem:[#allocation6 + $0x52c] sm:$0xf]  ;;  %v2604_v54 = vor.u32 %v3083_v42, %v2601_v43 }
  0xcc   : > { %1649 = vmatpush.bf16.msra.mxu0 %v2376_v6  ;;  %v3041_v6 = vld [vmem:[#allocation6 + $0x1b4] sm:$0xf]  ;;  %v3682_v10 = vsel %vm367_vm7, %v403_v59, %v404_v51  ;;  %v2328_v11 = vor.u32 %v3014_v62, %v2325_v63  ;;  %v2877_v45 = vld [vmem:[#allocation6 + $0x534] sm:$0xf0]  ;;  %v2307_v47 = vld [vmem:[#allocation6 + $0xb0] sm:$0xf] }
  0xcd   : > { %v3010_v48 = vld [vmem:[#allocation6 + $0xb8] sm:$0xf0]  ;;  %v2880_v55 = vor.u32 %v3152_v44, %v2877_v45  ;;  %v2865_v58 = vld [vmem:[#allocation6 + $0x51c] sm:$0xf0]  ;;  %v2295_v61 = vld [vmem:[#allocation6 + $0x98] sm:$0xf] }
  0xce   : > { %1662 = vmatpush.bf16.msra.mxu1 %v2484_v13  ;;  %v3089_v13 = vld [vmem:[#allocation6 + $0x334] sm:$0xf]  ;;  %v3034_v51 = vld [vmem:[#allocation6 + $0x178] sm:$0xf0]  ;;  %v2308_v56 = vor.u32 %v3010_v48, %v2307_v47  ;;  %v3007_v62 = vld [vmem:[#allocation6 + $0xa0] sm:$0xf0] }
  0xcf   : > { %1676 = vmatpush.bf16.msra.mxu2 %v2580_v16  ;;  %1690 = vmatpush.bf16.msra.mxu3 %v2676_v17  ;;  %v2313_v16 = vld [vmem:[#allocation6 + $0xcc] sm:$0xf0]  ;;  %v2436_v17 = vor.u32 %v3041_v6, %v2433_v7  ;;  %v2391_v63 = vld [vmem:[#allocation6 + $0x158] sm:$0xf]  ;;  %v2296_v7 = vor.u32 %v3007_v62, %v2295_v61  ;;  %v3146_v8 = vld [vmem:[#allocation6 + $0x4fc] sm:$0xf] }
  0xd0   : > { %1650 = vmatpush.bf16.msra.mxu0 %v2364_v21  ;;  %v2628_v21 = vor.u32 %v3089_v13, %v2625_v14  ;;  %v2316_v25 = vor.u32 %v3011_v15, %v2313_v16  ;;  %v2283_v14 = vld [vmem:[#allocation6 + $0x80] sm:$0xf]  ;;  %v3004_v15 = vld [vmem:[#allocation6 + $0x88] sm:$0xf0]  ;;  %v2733_v19 = vld [vmem:[#allocation6 + $0x414] sm:$0xf0] }
  0xd1   : > { %v2379_v16 = vld [vmem:[#allocation6 + $0x140] sm:$0xf]  ;;  %v3116_v18 = vld [vmem:[#allocation6 + $0x40c] sm:$0xf]  ;;  %v3143_v22 = vld [vmem:[#allocation6 + $0x4e4] sm:$0xf] }
  0xd2   : > { %1663 = vmatpush.bf16.msra.mxu1 %v2472_v30  ;;  %1599 = vmatmul.bf16.vlgmr.msrb.gmra.mxu0 %v3675_v40  ;;  %v3125_v30 = vld [vmem:[#allocation6 + $0x454] sm:$0xf]  ;;  %v2841_v23 = vld [vmem:[#allocation6 + $0x4ec] sm:$0xf0]  ;;  %v2271_v26 = vld [vmem:[#allocation6 + $0x68] sm:$0xf] }
  0xd3   : > { %1677 = vmatpush.bf16.msra.mxu2 %v2568_v33  ;;  %1691 = vmatpush.bf16.msra.mxu3 %v2664_v36  ;;  %v3035_v33 = vld [vmem:[#allocation6 + $0x184] sm:$0xf]  ;;  %v2409_v36 = vld [vmem:[#allocation6 + $0x18c] sm:$0xf0]  ;;  %v2772_v46 = vor.u32 %v3125_v30, %v2769_v32  ;;  %v3001_v27 = vld [vmem:[#allocation6 + $0x70] sm:$0xf0]  ;;  %v2844_v32 = vor.u32 %v3143_v22, %v2841_v23 }
  0xd4   : > { %1651 = vmatpush.bf16.msra.mxu0 %v2352_v41  ;;  %v2505_v41 = vld [vmem:[#allocation6 + $0x24c] sm:$0xf0]  ;;  %v2412_v50 = vor.u32 %v3035_v33, %v2409_v36  ;;  %v2367_v28 = vld [vmem:[#allocation6 + $0x128] sm:$0xf]  ;;  %v3113_v30 = vld [vmem:[#allocation6 + $0x3f4] sm:$0xf]  ;;  %v2272_v33 = vor.u32 %v3001_v27, %v2271_v26 }
  0xd5   : > { %v3140_v36 = vld [vmem:[#allocation6 + $0x4cc] sm:$0xf]  ;;  %v2998_v42 = vld [vmem:[#allocation6 + $0x58] sm:$0xf0]  ;;  %v2355_v43 = vld [vmem:[#allocation6 + $0x110] sm:$0xf] }
  0xd6   : > { %1664 = vmatpush.bf16.msra.mxu1 %v2460_v49  ;;  %v2403_v49 = vld [vmem:[#allocation6 + $0x170] sm:$0xf]  ;;  %v3022_v44 = vld [vmem:[#allocation6 + $0x118] sm:$0xf0]  ;;  %v3013_v23 = vld [vmem:[#allocation6 + $0xd0] sm:$0xf0] }
  0xd7   : > { %1678 = vmatpush.bf16.msra.mxu2 %v2556_v53  ;;  %1692 = vmatpush.bf16.msra.mxu3 %v2652_v35  ;;  %v2757_v53 = vld [vmem:[#allocation6 + $0x444] sm:$0xf0]  ;;  %v2508_v35 = vor.u32 %v3059_v39, %v2505_v41  ;;  %v2404_v59 = vor.u32 %v3034_v51, %v2403_v49  ;;  %v2259_v41 = vld [vmem:[#allocation6 + $0x50] sm:$0xf]  ;;  %v3110_v45 = vld [vmem:[#allocation6 + $0x3dc] sm:$0xf]  ;;  %v2356_v51 = vor.u32 %v3022_v44, %v2355_v43 }
  0xd8   : > { %1652 = vmatpush.bf16.msra.mxu0 %v2340_v57  ;;  %v3149_v57 = vld [vmem:[#allocation6 + $0x514] sm:$0xf]  ;;  %v2760_v60 = vor.u32 %v3122_v52, %v2757_v53  ;;  %v2260_v48 = vor.u32 %v2998_v42, %v2259_v41  ;;  %v2247_v53 = vld [vmem:[#allocation6 + $0x38] sm:$0xf]  ;;  %v2691_v26 = vld [vmem:[#allocation6 + $0x3b0] sm:$0xf] }
  0xd9   : > { %1613 = vmatmul.bf16.vlgmr.msrb.gmra.mxu1 %v3679_v9  ;;  %1627 = vmatmul.bf16.vlgmr.msrb.gmra.mxu2 %v3682_v10  ;;  %v2868_v6 = vor.u32 %v3149_v57, %v2865_v58  ;;  %v3137_v49 = vld [vmem:[#allocation6 + $0x4b4] sm:$0xf]  ;;  %v2697_v57 = vld [vmem:[#allocation6 + $0x3cc] sm:$0xf0]  ;;  %v3106_v27 = vld [vmem:[#allocation6 + $0x3b8] sm:$0xf0] }
  0xda   : > { %1641 = vmatmul.bf16.vlgmr.msrb.gmra.mxu3 %v3653_v34  ;;  %1665 = vmatpush.bf16.msra.mxu1 %v2448_v0  ;;  %v3031_v0 = vld [vmem:[#allocation6 + $0x160] sm:$0xf0]  ;;  %v2499_v58 = vld [vmem:[#allocation6 + $0x230] sm:$0xf]  ;;  %v2679_v44 = vld [vmem:[#allocation6 + $0x398] sm:$0xf] }
  0xdb   : > { %1679 = vmatpush.bf16.msra.mxu2 %v2544_v1  ;;  %1693 = vmatpush.bf16.msra.mxu3 %v2640_v2  ;;  %v3119_v1 = vld [vmem:[#allocation6 + $0x424] sm:$0xf]  ;;  %v2745_v2 = vld [vmem:[#allocation6 + $0x42c] sm:$0xf0]  ;;  %v2392_v12 = vor.u32 %v3031_v0, %v2391_v63  ;;  %v3134_v0 = vld [vmem:[#allocation6 + $0x49c] sm:$0xf] }
  0xdc   : > { %1653 = vmatpush.bf16.msra.mxu0 %v2328_v11  ;;  %v2853_v11 = vld [vmem:[#allocation6 + $0x504] sm:$0xf0]  ;;  %v2748_v13 = vor.u32 %v3119_v1, %v2745_v2  ;;  %v2235_v2 = vld [vmem:[#allocation6 + $0x20] sm:$0xf]  ;;  %v3079_v41 = vld [vmem:[#allocation6 + $0x2e0] sm:$0xf0] }
  0xdd   : > { %v2805_v1 = vld [vmem:[#allocation6 + $0x4a4] sm:$0xf0] }
  0xde   : > { %1666 = vmatpush.bf16.msra.mxu1 %v2436_v17  ;;  %v3028_v17 = vld [vmem:[#allocation6 + $0x148] sm:$0xf0] }
  0xdf   : > { %1680 = vmatpush.bf16.msra.mxu2 %v2532_v20  ;;  %1694 = vmatpush.bf16.msra.mxu3 %v2628_v21  ;;  %v2856_v20 = vor.u32 %v3146_v8, %v2853_v11  ;;  %v2284_v21 = vor.u32 %v3004_v15, %v2283_v14  ;;  %v2380_v24 = vor.u32 %v3028_v17, %v2379_v16  ;;  %v2331_v8 = vld [vmem:[#allocation6 + $0xe0] sm:$0xf]  ;;  %v3016_v11 = vld [vmem:[#allocation6 + $0xe8] sm:$0xf0]  ;;  %v3131_v15 = vld [vmem:[#allocation6 + $0x484] sm:$0xf] }
  0xe0   : > { %1654 = vmatpush.bf16.msra.mxu0 %v2316_v25  ;;  %v2736_v25 = vor.u32 %v3116_v18, %v2733_v19  ;;  %v2808_v14 = vor.u32 %v3134_v0, %v2805_v1  ;;  %v2793_v16 = vld [vmem:[#allocation6 + $0x48c] sm:$0xf0]  ;;  %v2332_v18 = vor.u32 %v3016_v11, %v2331_v8  ;;  %v2223_v19 = vld [vmem:[#allocation6 + $0x8] sm:$0xf]  ;;  %v3073_v0 = vld [vmem:[#allocation6 + $0x2b0] sm:$0xf0] }
  0xe1   : > { %v2751_v8 = vld [vmem:[#allocation6 + $0x428] sm:$0xf]  ;;  %v3121_v11 = vld [vmem:[#allocation6 + $0x430] sm:$0xf0] }
  0xe2   : > { %1667 = vmatpush.bf16.msra.mxu1 %v2424_v31  ;;  %v2721_v31 = vld [vmem:[#allocation6 + $0x3fc] sm:$0xf0] }
  0xe3   : > { %1681 = vmatpush.bf16.msra.mxu2 %v2520_v37  ;;  %1695 = vmatpush.bf16.msra.mxu3 %v2616_v38  ;;  %v2829_v37 = vld [vmem:[#allocation6 + $0x4d4] sm:$0xf0]  ;;  %v2724_v39 = vor.u32 %v3113_v30, %v2721_v31  ;;  %v3130_v30 = vld [vmem:[#allocation6 + $0x478] sm:$0xf0]  ;;  %v2475_v31 = vld [vmem:[#allocation6 + $0x200] sm:$0xf] }
  0xe4   : > { %1703 = vmatpush.bf16.msrb.mxu0 %v2784_v29  ;;  %v3025_v29 = vld [vmem:[#allocation6 + $0x130] sm:$0xf0]  ;;  %v2832_v47 = vor.u32 %v3140_v36, %v2829_v37 }
  0xe5   : > { %1655 = vmatmul.bf16.vlgmr.msra.gmra.mxu0 %v3663_v3  ;;  %v2368_v38 = vor.u32 %v3025_v29, %v2367_v28  ;;  %v2787_v28 = vld [vmem:[#allocation6 + $0x470] sm:$0xf]  ;;  %v2796_v29 = vor.u32 %v3131_v15, %v2793_v16  ;;  %v3070_v15 = vld [vmem:[#allocation6 + $0x298] sm:$0xf0]  ;;  %v2752_v16 = vor.u32 %v3121_v11, %v2751_v8  ;;  %v2847_v8 = vld [vmem:[#allocation6 + $0x4e8] sm:$0xf] }
  0xe6   : > { %1668 = vmatpush.bf16.msra.mxu1 %v2412_v50  ;;  %v2817_v50 = vld [vmem:[#allocation6 + $0x4bc] sm:$0xf0]  ;;  %v2788_v42 = vor.u32 %v3130_v30, %v2787_v28  ;;  %v2631_v30 = vld [vmem:[#allocation6 + $0x338] sm:$0xf]  ;;  %v3145_v11 = vld [vmem:[#allocation6 + $0x4f0] sm:$0xf0] }
  0xe7   : > { %1682 = vmatpush.bf16.msra.mxu2 %v2508_v35  ;;  %1696 = vmatpush.bf16.msra.mxu3 %v2604_v54  ;;  %v2995_v35 = vld [vmem:[#allocation6 + $0x40] sm:$0xf0]  ;;  %v2343_v54 = vld [vmem:[#allocation6 + $0xf8] sm:$0xf] }
  0xe8   : > { %1704 = vmatpush.bf16.msrb.mxu0 %v2772_v46  ;;  %v2709_v46 = vld [vmem:[#allocation6 + $0x3e4] sm:$0xf0]  ;;  %v2248_v61 = vor.u32 %v2995_v35, %v2247_v53  ;;  %v3076_v53 = vld [vmem:[#allocation6 + $0x2c8] sm:$0xf0] }
  0xe9   : > { %1669 = vmatmul.bf16.vlgmr.msra.gmra.mxu1 %v3666_v4  ;;  %v2712_v52 = vor.u32 %v3110_v45, %v2709_v46  ;;  %v3103_v45 = vld [vmem:[#allocation6 + $0x3a0] sm:$0xf0]  ;;  %v2775_v46 = vld [vmem:[#allocation6 + $0x458] sm:$0xf] }
  0xea   : > { %1717 = vmatpush.bf16.msrb.mxu1 %v2880_v55  ;;  %1683 = vmatmul.bf16.vlgmr.msra.gmra.mxu2 %v3669_v5  ;;  %v3019_v55 = vld [vmem:[#allocation6 + $0x100] sm:$0xf0] }
  0xeb   : > { %1731 = vmatpush.bf16.msrb.mxu2 %v2308_v56  ;;  %1745 = vmatpush.bf16.msrb.mxu3 %v2404_v59  ;;  %v3107_v56 = vld [vmem:[#allocation6 + $0x3c4] sm:$0xf]  ;;  %v3058_v59 = vld [vmem:[#allocation6 + $0x238] sm:$0xf0]  ;;  %v2344_v62 = vor.u32 %v3019_v55, %v2343_v54  ;;  %v2667_v55 = vld [vmem:[#allocation6 + $0x380] sm:$0xf] }
  0xec   : > { %1705 = vmatpush.bf16.msrb.mxu0 %v2760_v60  ;;  %1697 = vmatmul.bf16.vlgmr.msra.gmra.mxu3 %v3675_v40  ;;  %v2820_v60 = vor.u32 %v3137_v49, %v2817_v50  ;;  %v2700_v63 = vor.u32 %v3107_v56, %v2697_v57  ;;  %v3049_v49 = vld [vmem:[#allocation6 + $0x1f0] sm:$0xf0]  ;;  %v3100_v56 = vld [vmem:[#allocation6 + $0x388] sm:$0xf0]  ;;  %v2763_v57 = vld [vmem:[#allocation6 + $0x440] sm:$0xf] }
  0xee   : > { %1718 = vmatpush.bf16.msrb.mxu1 %v2868_v6  ;;  %v2500_v6 = vor.u32 %v3058_v59, %v2499_v58  ;;  %v3124_v58 = vld [vmem:[#allocation6 + $0x448] sm:$0xf0]  ;;  %v2451_v59 = vld [vmem:[#allocation6 + $0x1d0] sm:$0xf] }
  0xef   : > { %1732 = vmatpush.bf16.msrb.mxu2 %v2296_v7  ;;  %1746 = vmatpush.bf16.msrb.mxu3 %v2392_v12  ;;  %v2992_v7 = vld [vmem:[#allocation6 + $0x28] sm:$0xf0]  ;;  %v2487_v12 = vld [vmem:[#allocation6 + $0x218] sm:$0xf]  ;;  %v2764_v1 = vor.u32 %v3124_v58, %v2763_v57  ;;  %v3061_v57 = vld [vmem:[#allocation6 + $0x250] sm:$0xf0] }
  0xf0   : > { %1706 = vmatpush.bf16.msrb.mxu0 %v2748_v13  ;;  %v3055_v13 = vld [vmem:[#allocation6 + $0x220] sm:$0xf0]  ;;  %v2236_v17 = vor.u32 %v2992_v7, %v2235_v2  ;;  %v3097_v7 = vld [vmem:[#allocation6 + $0x370] sm:$0xf0]  ;;  %v2607_v58 = vld [vmem:[#allocation6 + $0x308] sm:$0xf] }
  0xf1   : > { %v2488_v22 = vor.u32 %v3055_v13, %v2487_v12  ;;  %v3043_v12 = vld [vmem:[#allocation6 + $0x1c0] sm:$0xf0] }
  0xf2   : > { %1719 = vmatpush.bf16.msrb.mxu1 %v2856_v20  ;;  %v2989_v20 = vld [vmem:[#allocation6 + $0x10] sm:$0xf0] }
  0xf3   : > { %1733 = vmatpush.bf16.msrb.mxu2 %v2284_v21  ;;  %1747 = vmatpush.bf16.msrb.mxu3 %v2380_v24  ;;  %v2319_v21 = vld [vmem:[#allocation6 + $0xc8] sm:$0xf]  ;;  %v2595_v24 = vld [vmem:[#allocation6 + $0x2f0] sm:$0xf] }
  0xf4   : > { %1707 = vmatpush.bf16.msrb.mxu0 %v2736_v25  ;;  %v3082_v25 = vld [vmem:[#allocation6 + $0x2f8] sm:$0xf0]  ;;  %v2320_v36 = vor.u32 %v3013_v23, %v2319_v21  ;;  %v3040_v23 = vld [vmem:[#allocation6 + $0x1a8] sm:$0xf0] }
  0xf5   : > { %v2596_v37 = vor.u32 %v3082_v25, %v2595_v24  ;;  %v3118_v21 = vld [vmem:[#allocation6 + $0x418] sm:$0xf0] }
  0xf6   : > { %1720 = vmatpush.bf16.msrb.mxu1 %v2844_v32  ;;  %v3052_v32 = vld [vmem:[#allocation6 + $0x208] sm:$0xf0] }
  0xf7   : > { %1734 = vmatpush.bf16.msrb.mxu2 %v2272_v33  ;;  %1748 = vmatpush.bf16.msrb.mxu3 %v2368_v38  ;;  %v2224_v33 = vor.u32 %v2989_v20, %v2223_v19  ;;  %v2692_v38 = vor.u32 %v3106_v27, %v2691_v26  ;;  %v2476_v43 = vor.u32 %v3052_v32, %v2475_v31  ;;  %v3094_v19 = vld [vmem:[#allocation6 + $0x358] sm:$0xf0]  ;;  %v2739_v20 = vld [vmem:[#allocation6 + $0x410] sm:$0xf]  ;;  %v2535_v26 = vld [vmem:[#allocation6 + $0x278] sm:$0xf] }
  0xf8   : > { %1708 = vmatpush.bf16.msrb.mxu0 %v2724_v39  ;;  %v2583_v39 = vld [vmem:[#allocation6 + $0x2d8] sm:$0xf]  ;;  %v3067_v27 = vld [vmem:[#allocation6 + $0x280] sm:$0xf0]  ;;  %v2740_v28 = vor.u32 %v3118_v21, %v2739_v20  ;;  %v2799_v20 = vld [vmem:[#allocation6 + $0x488] sm:$0xf] }
  0xf9   : > { %v2584_v50 = vor.u32 %v3079_v41, %v2583_v39  ;;  %v3091_v31 = vld [vmem:[#allocation6 + $0x340] sm:$0xf0]  ;;  %v2727_v32 = vld [vmem:[#allocation6 + $0x3f8] sm:$0xf]  ;;  %v3154_v39 = vld [vmem:[#allocation6 + $0x538] sm:$0xf0]  ;;  %v2536_v41 = vor.u32 %v3067_v27, %v2535_v26 }
  0xfa   : > { %1721 = vmatpush.bf16.msrb.mxu1 %v2832_v47  ;;  %v3127_v47 = vld [vmem:[#allocation6 + $0x460] sm:$0xf0]  ;;  %v3161_v21 = vld [vmem:[#allocation9 + $0x30] sm:$0xff]  ;;  %v3156_v27 = vld [vmem:[#allocation9 + $0x8] sm:$0xff] }
  0xfb   : > { %1735 = vmatpush.bf16.msrb.mxu2 %v2260_v48  ;;  %1749 = vmatpush.bf16.msrb.mxu3 %v2356_v51  ;;  %v2463_v48 = vld [vmem:[#allocation6 + $0x1e8] sm:$0xf]  ;;  %v2680_v51 = vor.u32 %v3103_v45, %v2679_v44  ;;  %v2776_v35 = vor.u32 %v3127_v47, %v2775_v46  ;;  %v2523_v45 = vld [vmem:[#allocation6 + $0x260] sm:$0xf]  ;;  %v3064_v46 = vld [vmem:[#allocation6 + $0x268] sm:$0xf0] }
  0xfc   : > { %1709 = vmatpush.bf16.msrb.mxu0 %v2712_v52  ;;  %v2571_v52 = vld [vmem:[#allocation6 + $0x2c0] sm:$0xf]  ;;  %v2464_v54 = vor.u32 %v3049_v49, %v2463_v48  ;;  %v3088_v49 = vld [vmem:[#allocation6 + $0x328] sm:$0xf0] }
  0xfd   : > { %v2619_v47 = vld [vmem:[#allocation6 + $0x320] sm:$0xf] }
  0xfe   : > { %1722 = vmatpush.bf16.msrb.mxu1 %v2820_v60  ;;  %v3046_v60 = vld [vmem:[#allocation6 + $0x1d8] sm:$0xf0] }
  0xff   : > { %1736 = vmatpush.bf16.msrb.mxu2 %v2248_v61  ;;  %1750 = vmatpush.bf16.msrb.mxu3 %v2344_v62  ;;  %v2572_v61 = vor.u32 %v3076_v53, %v2571_v52  ;;  %v2668_v62 = vor.u32 %v3100_v56, %v2667_v55  ;;  %v2452_v2 = vor.u32 %v3046_v60, %v2451_v59  ;;  %v2871_v52 = vld [vmem:[#allocation6 + $0x518] sm:$0xf]  ;;  %v3151_v53 = vld [vmem:[#allocation6 + $0x520] sm:$0xf0]  ;;  %v2511_v56 = vld [vmem:[#allocation6 + $0x248] sm:$0xf] }
 0x100   : > { %1710 = vmatpush.bf16.msrb.mxu0 %v2700_v63  ;;  %v2559_v63 = vld [vmem:[#allocation6 + $0x2a8] sm:$0xf]  ;;  %v2872_v59 = vor.u32 %v3151_v53, %v2871_v52  ;;  %v3085_v60 = vld [vmem:[#allocation6 + $0x310] sm:$0xf0] }
 0x101   : > { %v2560_v13 = vor.u32 %v3073_v0, %v2559_v63  ;;  %v2859_v63 = vld [vmem:[#allocation6 + $0x500] sm:$0xf]  ;;  %v3148_v0 = vld [vmem:[#allocation6 + $0x508] sm:$0xf0] }
 0x102   : > { %1723 = vmatpush.bf16.msrb.mxu1 %v2808_v14  ;;  %v2547_v14 = vld [vmem:[#allocation6 + $0x290] sm:$0xf] }
 0x103   : > { %1711 = vmatmul.bf16.vlgmr.msrb.gmra.mxu0 %v3679_v9  ;;  %1737 = vmatpush.bf16.msrb.mxu2 %v2236_v17  ;;  %v2548_v24 = vor.u32 %v3070_v15, %v2547_v14  ;;  %v3139_v14 = vld [vmem:[#allocation6 + $0x4c0] sm:$0xf0] }
 0x104   : > { %1759 = vmatpush.bf16.msra.mxu0 %v2500_v6  ;;  %1751 = vmatpush.bf16.msrb.mxu3 %v2332_v18  ;;  %v2655_v6 = vld [vmem:[#allocation6 + $0x368] sm:$0xf]  ;;  %v2643_v18 = vld [vmem:[#allocation6 + $0x350] sm:$0xf] }
 0x105   : > { %v2644_v25 = vor.u32 %v3094_v19, %v2643_v18  ;;  %v3162_v18 = vld [vmem:[#allocation9 + $0x38] sm:$0xff] }
 0x106   : > { %1724 = vmatpush.bf16.msrb.mxu1 %v2796_v29 }
 0x107   : > { %1738 = vmatpush.bf16.msrb.mxu2 %v2224_v33  ;;  %v3115_v33 = vld [vmem:[#allocation6 + $0x400] sm:$0xf0] }
 0x108   : > { %1760 = vmatpush.bf16.msra.mxu0 %v2488_v22  ;;  %1752 = vmatpush.bf16.msrb.mxu3 %v2320_v36  ;;  %v2427_v22 = vld [vmem:[#allocation6 + $0x1a0] sm:$0xf]  ;;  %v2415_v36 = vld [vmem:[#allocation6 + $0x188] sm:$0xf] }
 0x109   : > { %1725 = vmatmul.bf16.vlgmr.msrb.gmra.mxu1 %v3682_v10  ;;  %v2428_v29 = vor.u32 %v3040_v23, %v2427_v22  ;;  %v3158_v23 = vld [vmem:[#allocation9 + $0x18] sm:$0xff] }
 0x10a   : > { %1773 = vmatpush.bf16.msra.mxu1 %v2596_v37  ;;  %1739 = vmatmul.bf16.vlgmr.msrb.gmra.mxu2 %v3653_v34  ;;  %v2439_v34 = vld [vmem:[#allocation6 + $0x1b8] sm:$0xf]  ;;  %v3037_v37 = vld [vmem:[#allocation6 + $0x190] sm:$0xf0] }
 0x10b   : > { %1787 = vmatpush.bf16.msra.mxu2 %v2692_v38  ;;  %1753 = vmatmul.bf16.vlgmr.msrb.gmra.mxu3 %v3663_v3  ;;  %v2656_v3 = vor.u32 %v3097_v7, %v2655_v6  ;;  %v2440_v17 = vor.u32 %v3043_v12, %v2439_v34  ;;  %v2883_v38 = vld [vmem:[#allocation6 + $0x530] sm:$0xf]  ;;  %v2416_v44 = vor.u32 %v3037_v37, %v2415_v36  ;;  %v3170_v36 = vld [vmem:[#allocation9 + $0x78] sm:$0xff] }
 0x10c   : > { %1801 = vmatpush.bf16.msra.mxu3 %v2788_v42  ;;  %1761 = vmatpush.bf16.msra.mxu0 %v2476_v43  ;;  %v2632_v42 = vor.u32 %v3091_v31, %v2631_v30  ;;  %v2728_v43 = vor.u32 %v3115_v33, %v2727_v32  ;;  %v2884_v48 = vor.u32 %v3154_v39, %v2883_v38  ;;  %v2835_v12 = vld [vmem:[#allocation6 + $0x4d0] sm:$0xf]  ;;  %v3700_v30 = vld [vmem:[#allocation8] sm:$0x7] }
 0x10d   : > { %v2860_v7 = vor.u32 %v3148_v0, %v2859_v63  ;;  %v2848_v34 = vor.u32 %v3145_v11, %v2847_v8  ;;  %v633_v33 = vperm.slane %v3700_v30, 0  ;;  %v3163_v11 = vld [vmem:[#allocation9 + $0x40] sm:$0xff] }
 0x10e   : > { %1774 = vmatpush.bf16.msra.mxu1 %v2584_v50  ;;  %v2715_v50 = vld [vmem:[#allocation6 + $0x3e0] sm:$0xf] }
 0x10f   : > { %1788 = vmatpush.bf16.msra.mxu2 %v2680_v51  ;;  %v3112_v51 = vld [vmem:[#allocation6 + $0x3e8] sm:$0xf0] }
 0x110   : > { %1802 = vmatpush.bf16.msra.mxu3 %v2776_v35  ;;  %1762 = vmatpush.bf16.msra.mxu0 %v2464_v54  ;;  %v2524_v35 = vor.u32 %v3064_v46, %v2523_v45  ;;  %v2620_v54 = vor.u32 %v3088_v49, %v2619_v47  ;;  %v2716_v55 = vor.u32 %v3112_v51, %v2715_v50  ;;  %v3169_v46 = vld [vmem:[#allocation9 + $0x70] sm:$0xff] }
 0x112   : > { %1775 = vmatpush.bf16.msra.mxu1 %v2572_v61  ;;  %v2703_v61 = vld [vmem:[#allocation6 + $0x3c8] sm:$0xf] }
 0x113   : > { %1789 = vmatpush.bf16.msra.mxu2 %v2668_v62  ;;  %v3109_v62 = vld [vmem:[#allocation6 + $0x3d0] sm:$0xf0] }
 0x114   : > { %1803 = vmatpush.bf16.msra.mxu3 %v2764_v1  ;;  %1763 = vmatpush.bf16.msra.mxu0 %v2452_v2  ;;  %v2512_v1 = vor.u32 %v3061_v57, %v2511_v56  ;;  %v2608_v2 = vor.u32 %v3085_v60, %v2607_v58  ;;  %v2704_v6 = vor.u32 %v3109_v62, %v2703_v61  ;;  %v3166_v61 = vld [vmem:[#allocation9 + $0x58] sm:$0xff] }
 0x116   : > { %1776 = vmatpush.bf16.msra.mxu1 %v2560_v13  ;;  %v3142_v13 = vld [vmem:[#allocation6 + $0x4d8] sm:$0xf0] }
 0x117   : > { %1790 = vmatpush.bf16.msra.mxu2 %v2656_v3  ;;  %v2823_v3 = vld [vmem:[#allocation6 + $0x4b8] sm:$0xf] }
 0x118   : > { %1804 = vmatpush.bf16.msra.mxu3 %v2752_v16  ;;  %1764 = vmatpush.bf16.msra.mxu0 %v2440_v17  ;;  %v2824_v15 = vor.u32 %v3139_v14, %v2823_v3  ;;  %v2811_v16 = vld [vmem:[#allocation6 + $0x4a0] sm:$0xf]  ;;  %v3136_v17 = vld [vmem:[#allocation6 + $0x4a8] sm:$0xf0] }
 0x119   : > { %v2812_v19 = vor.u32 %v3136_v17, %v2811_v16 }
 0x11a   : > { %1777 = vmatpush.bf16.msra.mxu1 %v2548_v24 }
 0x11b   : > { %1791 = vmatpush.bf16.msra.mxu2 %v2644_v25  ;;  %v3157_v25 = vld [vmem:[#allocation9 + $0x10] sm:$0xff] }
 0x11c   : > { %1805 = vmatpush.bf16.msra.mxu3 %v2740_v28  ;;  %1765 = vmatpush.bf16.msra.mxu0 %v2428_v29  ;;  %v3155_v29 = vld [vmem:[#allocation9] sm:$0xff] }
 0x11e   : > { %1778 = vmatpush.bf16.msra.mxu1 %v2536_v41 }
 0x11f   : > { %1792 = vmatpush.bf16.msra.mxu2 %v2632_v42 }
 0x120   : > { %1806 = vmatpush.bf16.msra.mxu3 %v2728_v43  ;;  %1766 = vmatpush.bf16.msra.mxu0 %v2416_v44 }
 0x122   : > { %1779 = vmatpush.bf16.msra.mxu1 %v2524_v35  ;;  %v3167_v35 = vld [vmem:[#allocation9 + $0x60] sm:$0xff] }
 0x123   : > { %1767 = vmatmul.bf16.vlgmr.msra.gmra.mxu0 %v3666_v4  ;;  %1793 = vmatpush.bf16.msra.mxu2 %v2620_v54  ;;  %v2836_v4 = vor.u32 %v3142_v13, %v2835_v12 }
 0x124   : > { %1815 = vmatpush.bf16.msrb.mxu0 %v2884_v48  ;;  %1807 = vmatpush.bf16.msra.mxu3 %v2716_v55  ;;  %v3168_v48 = vld [vmem:[#allocation9 + $0x68] sm:$0xff] }
 0x126   : > { %1780 = vmatpush.bf16.msra.mxu1 %v2512_v1  ;;  %v3165_v1 = vld [vmem:[#allocation9 + $0x50] sm:$0xff] }
 0x127   : > { %1794 = vmatpush.bf16.msra.mxu2 %v2608_v2 }
 0x128   : > { %1816 = vmatpush.bf16.msrb.mxu0 %v2872_v59  ;;  %1808 = vmatpush.bf16.msra.mxu3 %v2704_v6 }
 0x129   : > { %1781 = vmatmul.bf16.vlgmr.msra.gmra.mxu1 %v3669_v5  ;;  %v3133_v5 = vld [vmem:[#allocation6 + $0x490] sm:$0xf0] }
 0x12a   : > { %1795 = vmatmul.bf16.vlgmr.msra.gmra.mxu2 %v3675_v40  ;;  %2034 = vmatpush.bf16.msrb.mxu1 %v3162_v18  ;;  %v2800_v22 = vor.u32 %v3133_v5, %v2799_v20  ;;  %v3160_v40 = vld [vmem:[#allocation9 + $0x28] sm:$0xff] }
 0x12b   : > { %1809 = vmatmul.bf16.vlgmr.msra.gmra.mxu3 %v3679_v9  ;;  %v3159_v9 = vld [vmem:[#allocation9 + $0x20] sm:$0xff]  ;;  %2048 = vmatpush.bf16.msrb.mxu2 %v3170_v36 }
 0x12c   : > { %1817 = vmatpush.bf16.msrb.mxu0 %v2860_v7  ;;  %v3164_v7 = vld [vmem:[#allocation9 + $0x48] sm:$0xff] }
 0x12e   : > { %2035 = vmatpush.bf16.msrb.mxu1 %v3161_v21 }
 0x12f   : > { %2049 = vmatpush.bf16.msrb.mxu2 %v3169_v46  ;;  %v3172_v46 = vld [vmem:[#allocation9 + $0x88] sm:$0xff] }
 0x130   : > { %1818 = vmatpush.bf16.msrb.mxu0 %v2848_v34 }
 0x132   : > { %2036 = vmatpush.bf16.msrb.mxu1 %v3160_v40 }
 0x133   : > { %2050 = vmatpush.bf16.msrb.mxu2 %v3168_v48  ;;  %v3171_v48 = vld [vmem:[#allocation9 + $0x80] sm:$0xff] }
 0x134   : > { %1819 = vmatpush.bf16.msrb.mxu0 %v2836_v4  ;;  %v634_v4 = vperm.slane %v3700_v30, 1 }
 0x136   : > { %2037 = vmatpush.bf16.msrb.mxu1 %v3159_v9 }
 0x137   : > { %2051 = vmatpush.bf16.msrb.mxu2 %v3167_v35 }
 0x138   : > { %1820 = vmatpush.bf16.msrb.mxu0 %v2824_v15 }
 0x13a   : > { %2038 = vmatpush.bf16.msrb.mxu1 %v3158_v23 }
 0x13b   : > { %2052 = vmatpush.bf16.msrb.mxu2 %v3166_v61 }
 0x13c   : > { %1821 = vmatpush.bf16.msrb.mxu0 %v2812_v19 }
 0x13e   : > { %2039 = vmatpush.bf16.msrb.mxu1 %v3157_v25 }
 0x13f   : > { %v1544_v24 = vpop.f32.mrf.mxu0  ;;  %2053 = vmatpush.bf16.msrb.mxu2 %v3165_v1 }
 0x140   : > { %1822 = vmatpush.bf16.msrb.mxu0 %v2800_v22  ;;  %v1545_v37 = vadd.f32 %v1544_v24, %v633_v33  ;;  %v3178_v24 = vld [vmem:[#allocation9 + $0xb8] sm:$0xff] }
 0x141   : > { %2062 = vmatpush.bf16.msrb.mxu3 %v3178_v24 }
 0x142   : > { %2040 = vmatpush.bf16.msrb.mxu1 %v3156_v27 }
 0x143   : > { %1823 = vmatmul.bf16.vlgmr.msrb.gmra.mxu0 %v3682_v10  ;;  %2054 = vmatpush.bf16.msrb.mxu2 %v3164_v7 }
 0x146   : > { %v1558_v26 = vpop.f32.mrf.mxu1  ;;  %2041 = vmatpush.bf16.msrb.mxu1 %v3155_v29 }
 0x147   : > { %v1546_v28 = vpop.f32.mrf.mxu0  ;;  %v1559_v41 = vadd.f32 %v1558_v26, %v1545_v37  ;;  %2055 = vmatpush.bf16.msrb.mxu2 %v3163_v11  ;;  %v3176_v37 = vld [vmem:[#allocation9 + $0xa8] sm:$0xff] }
 0x148   : > { %v1547_v42 = vadd.f32 %v1546_v28, %v633_v33 }
 0x14c   : > { %v1572_v31 = vpop.f32.mrf.mxu2 }
 0x14d   : > { %v1586_v10 = vpop.f32.mrf.mxu3  ;;  %v1573_v44 = vadd.f32 %v1572_v31, %v1559_v41  ;;  %v3177_v31 = vld [vmem:[#allocation9 + $0xb0] sm:$0xff] }
 0x14e   : > { %v1560_v32 = vpop.f32.mrf.mxu1  ;;  %2063 = vmatpush.bf16.msrb.mxu3 %v3177_v31 }
 0x14f   : > { %v1600_v38 = vpop.f32.mrf.mxu0  ;;  %v1561_v45 = vadd.f32 %v1560_v32, %v1547_v42  ;;  %v1587_v49 = vadd.f32 %v1586_v10, %v1573_v44  ;;  %v3175_v42 = vld [vmem:[#allocation9 + $0xa0] sm:$0xff]  ;;  %v3173_v44 = vld [vmem:[#allocation9 + $0x90] sm:$0xff] }
 0x151   : > { %v1601_v54 = vadd.f32 %v1600_v38, %v1587_v49 }
 0x152   : > { %2064 = vmatpush.bf16.msrb.mxu3 %v3176_v37 }
 0x154   : > { %v1574_v39 = vpop.f32.mrf.mxu2 }
 0x155   : > { %v1575_v47 = vadd.f32 %v1574_v39, %v1561_v45  ;;  %v1588_v50 = vpop.f32.mrf.mxu3 }
 0x156   : > { %v1614_v43 = vpop.f32.mrf.mxu1  ;;  %2065 = vmatpush.bf16.msrb.mxu3 %v3175_v42 }
 0x157   : > { %v1589_v52 = vadd.f32 %v1588_v50, %v1575_v47  ;;  %v1602_v53 = vpop.f32.mrf.mxu0  ;;  %v1615_v56 = vadd.f32 %v1614_v43, %v1601_v54  ;;  %v3174_v43 = vld [vmem:[#allocation9 + $0x98] sm:$0xff] }
 0x159   : > { %v1603_v57 = vadd.f32 %v1602_v53, %v1589_v52 }
 0x15a   : > { %2066 = vmatpush.bf16.msrb.mxu3 %v3174_v43 }
 0x15c   : > { %v1628_v51 = vpop.f32.mrf.mxu2 }
 0x15d   : > { %v1629_v58 = vadd.f32 %v1628_v51, %v1615_v56  ;;  %v1642_v6 = vpop.f32.mrf.mxu3  ;;  %v635_v51 = vperm.slane %v3700_v30, 2 }
 0x15e   : > { %v1616_v55 = vpop.f32.mrf.mxu1  ;;  %v1643_v14 = vadd.f32 %v1642_v6, %v634_v4  ;;  %2067 = vmatpush.bf16.msrb.mxu3 %v3173_v44 }
 0x15f   : > { %v1617_v59 = vadd.f32 %v1616_v55, %v1603_v57  ;;  %v1829_v63 = vmax.f32 %v1629_v58, 0.0 }
 0x162   : > { %v1656_v8 = vpop.f32.mrf.mxu0  ;;  %2068 = vmatpush.bf16.msrb.mxu3 %v3172_v46 }
 0x163   : > { %v1657_v19 = vadd.f32 %v1656_v8, %v1643_v14 }
 0x164   : > { %v1630_v60 = vpop.f32.mrf.mxu2 }
 0x165   : > { %v1631_v62 = vadd.f32 %v1630_v60, %v1617_v59  ;;  %v1644_v12 = vpop.f32.mrf.mxu3 }
 0x166   : > { %v1670_v34 = vpop.f32.mrf.mxu1  ;;  %v1645_v16 = vadd.f32 %v1644_v12, %v634_v4  ;;  %2069 = vmatpush.bf16.msrb.mxu3 %v3171_v48 }
 0x167   : > { %v1832_v0 = vmax.f32 %v1631_v62, 0.0  ;;  %v1671_v20 = vadd.f32 %v1670_v34, %v1657_v19 }
 0x169   : > { %v1835_v2 = vpack.c.bf16 %v1832_v0, %v1829_v63 }
 0x16a   : > { %v1658_v13 = vpop.f32.mrf.mxu0 }
 0x16b   : > { %2042 = vmatmul.bf16.vlgmr.msrb.gmra.mxu1 %v1835_v2  ;;  %v1659_v5 = vadd.f32 %v1658_v13, %v1645_v16  ;;  %v3273_v16 = vld [vmem:[%s3746_s4] ss:$0 sm:$0xff] }
 0x16d   : > { %v1684_v3 = vpop.f32.mrf.mxu2 }
 0x16e   : > { %v1672_v15 = vpop.f32.mrf.mxu1  ;;  %v1685_v22 = vadd.f32 %v1684_v3, %v1671_v20 }
 0x16f   : > { %v1698_v17 = vpop.f32.mrf.mxu3  ;;  %v1673_v40 = vadd.f32 %v1672_v15, %v1659_v5 }
 0x170   : > { %v1699_v25 = vadd.f32 %v1698_v17, %v1685_v22 }
 0x175   : > { %v1686_v21 = vpop.f32.mrf.mxu2 }
 0x176   : > { %v1687_v23 = vadd.f32 %v1686_v21, %v1673_v40 }
 0x177   : > { %v1700_v26 = vpop.f32.mrf.mxu3 }
 0x178   : > { %v1701_v28 = vadd.f32 %v1700_v26, %v1687_v23 }
 0x180   : > { %v1712_v18 = vpop.f32.mrf.mxu0 }
 0x181   : > { %v1713_v29 = vadd.f32 %v1712_v18, %v1699_v25 }
 0x186   : > { %v1726_v9 = vpop.f32.mrf.mxu1 }
 0x187   : > { %v1727_v32 = vadd.f32 %v1726_v9, %v1713_v29 }
 0x188   : > { %v1714_v27 = vpop.f32.mrf.mxu0 }
 0x189   : > { %v1715_v33 = vadd.f32 %v1714_v27, %v1701_v28  ;;  %v1830_v38 = vmax.f32 %v1727_v32, 0.0 }
 0x18d   : > { %v1740_v45 = vpop.f32.mrf.mxu2 }
 0x18e   : > { %v1728_v36 = vpop.f32.mrf.mxu1  ;;  %v1754_v47 = vpop.f32.mrf.mxu3  ;;  %v1741_v54 = vadd.f32 %v1740_v45, %v635_v51 }
 0x18f   : > { %v1729_v10 = vadd.f32 %v1728_v36, %v1715_v33 }
 0x190   : > { %v1755_v57 = vadd.f32 %v1754_v47, %v1741_v54 }
 0x191   : > { %v1833_v39 = vmax.f32 %v1729_v10, 0.0 }
 0x193   : > { %v1836_v41 = vpack.c.bf16 %v1833_v39, %v1830_v38 }
 0x195   : > { %2056 = vmatmul.bf16.vlgmr.msrb.gmra.mxu2 %v1836_v41  ;;  %v1742_v49 = vpop.f32.mrf.mxu2 }
 0x196   : > { %v1756_v52 = vpop.f32.mrf.mxu3  ;;  %v1743_v56 = vadd.f32 %v1742_v49, %v635_v51 }
 0x198   : > { %v1757_v59 = vadd.f32 %v1756_v52, %v1743_v56 }
 0x1a0   : > { %v1768_v50 = vpop.f32.mrf.mxu0 }
 0x1a1   : > { %v1769_v60 = vadd.f32 %v1768_v50, %v1755_v57 }
 0x1a6   : > { %v1782_v53 = vpop.f32.mrf.mxu1 }
 0x1a7   : > { %v1783_v62 = vadd.f32 %v1782_v53, %v1769_v60 }
 0x1a8   : > { %v1770_v55 = vpop.f32.mrf.mxu0 }
 0x1a9   : > { %v1771_v63 = vadd.f32 %v1770_v55, %v1757_v59 }
 0x1ad   : > { %v1796_v35 = vpop.f32.mrf.mxu2 }
 0x1ae   : > { %v1810_v58 = vpop.f32.mrf.mxu3  ;;  %v1784_v61 = vpop.f32.mrf.mxu1  ;;  %v1797_v2 = vadd.f32 %v1796_v35, %v1783_v62 }
 0x1af   : > { %v1785_v6 = vadd.f32 %v1784_v61, %v1771_v63 }
 0x1b0   : > { %v1811_v30 = vadd.f32 %v1810_v58, %v1797_v2 }
 0x1b5   : > { %v1798_v0 = vpop.f32.mrf.mxu2 }
 0x1b6   : > { %v1799_v7 = vadd.f32 %v1798_v0, %v1785_v6  ;;  %v1812_v8 = vpop.f32.mrf.mxu3 }
 0x1b8   : > { %v1813_v11 = vadd.f32 %v1812_v8, %v1799_v7 }
 0x1c0   : > { %v1824_v1 = vpop.f32.mrf.mxu0 }
 0x1c1   : > { %v1825_v34 = vadd.f32 %v1824_v1, %v1811_v30 }
 0x1c3   : > { %v1831_v4 = vmax.f32 %v1825_v34, 0.0 }
 0x1c8   : > { %v1826_v12 = vpop.f32.mrf.mxu0 }
 0x1c9   : > { %v1827_v13 = vadd.f32 %v1826_v12, %v1813_v11 }
 0x1cb   : > { %v1834_v3 = vmax.f32 %v1827_v13, 0.0 }
 0x1cd   : > { %v1837_v14 = vpack.c.bf16 %v1834_v3, %v1831_v4 }
 0x1cf   : > { %2070 = vmatmul.bf16.vlgmr.msrb.gmra.mxu3 %v1837_v14 }
 0x1e8   : > { %v2043_v15 = vpop.f32.mrf.mxu1 }
 0x1e9   : > { %v2044_v18 = vadd.f32 %v3273_v16, %v2043_v15 }
 0x1f0   : > { %v2045_v21 = vpop.f32.mrf.mxu1 }
 0x1f1   : > { %v2046_v9 = vadd.f32 %v3273_v16, %v2045_v21 }
 0x218   : > { %v2057_v17 = vpop.f32.mrf.mxu2 }
 0x219   : > { %v2058_v19 = vadd.f32 %v2057_v17, %v2044_v18 }
 0x220   : > { %v2059_v40 = vpop.f32.mrf.mxu2 }
 0x221   : > { %v2060_v23 = vadd.f32 %v2059_v40, %v2046_v9 }
 0x252   : > { %v2071_v20 = vpop.f32.mrf.mxu3 }
 0x253   : > { %v2072_v5 = vadd.f32 %v2071_v20, %v2058_v19 }
 0x255   : > { %v2076_v22 = vmax.f32 %v2072_v5, 0.0 }
 0x257   : > { %2078 = vst [vmem:[%s292_s12] sm:$0xff] %v2076_v22 }
 0x25a   : > { %v2073_v24 = vpop.f32.mrf.mxu3 }
 0x25b   : > { %v2074_v25 = vadd.f32 %v2073_v24, %v2060_v23 }
 0x25d   : > { %v2077_v26 = vmax.f32 %v2074_v25, 0.0 }
 0x25f   : > { %2079 = vst [vmem:[%s292_s12 + $0x8] sm:$0xff] %v2077_v26 }
 0x260   : > { %3421 = shalt.err (!%p3418_p10)
}
 0x261   : > { %s3479_s17 = smov 128   ;;  %s3480_s16 = smov 8  }
 0x262   : > { %3202 = dma.vmem_to_hbm [thread:$0]  (%p3596_p3), %s2094_s14, 256, %s2096_s15, %s2081_s22, %s3479_s17, %s3479_s17, %s3480_s16  }
 0x263 PF: > { %s2110_s23 = sand.u32 1, %s3456_s18   ;;  %p3758_p12 = scmp.ge.s32.totalorder %s3468_s21, 2 }
 0x264   : > { %s2111_s26 = scalar_lea.sflag [#allocation5], %s2110_s23 }
 0x265   : > { %p3219_p13 = pnand %p3758_p12, %p3546_p6 }
 0x267   : > { %p3220_p0 = pneg %p3219_p13 }
 0x269   : > { %3451 = dma.done.wait (%p3220_p0), %s2111_s26, 256  }
 0x26a   : > { %3453 = vsyncadd (%p3220_p0), %s2111_s26, 4294967040  ;;  %p20_p5 = scmp.ge.s32.totalorder %s3583_s30, 4   ;;  %s3759_s18 = smov %s3460_s19 }
 0x26b   : > { %s3760_s19 = smov %s3464_s20  ;;  %s3761_s20 = smov %s3592_s9 }
 0x26c   : > { %s3762_s21 = smov %s3583_s30  ;;  %22 = sbr.rel (!%p20_p5) target bundleno = 7 (0x7), region = 97 }
 0x271   :  { %2117 = vsyncpa [#allocation4], 1 }
 0x272   :  { %2119 = vsyncpa [#allocation4 + $0x1], 1 }
 0x273   :  { %2120 = vsyncpa [#allocation7], 1 }
 0x274   :  { %2121 = vsyncpa [#allocation10], 1 }
 0x275   :  { %2122 = vsyncpa [#allocation5], 1 }
 0x276   :  { %2124 = vsyncpa [#allocation5 + $0x1], 1 }

</bundles_post_ra>
